<compile_context>
chip_gen: v5e
topology: v5e:2x2
jax: 0.10.0
libtpu: 0.0.40
codegen_flags: <defaults>
</compile_context>

<pallas_src>
import math

import jax
import jax.numpy as jnp
from jax.experimental import pallas as pl
from jax.experimental.pallas import tpu as pltpu

KH = KW = 3
BN_EPS = 1e-5


# --------------------------------------------------------------------------
# Pass 1: per-image conv (single im2col MXU matmul) + partial BN statistics.
# --------------------------------------------------------------------------
def conv_stats_kernel(xp_ref, w_ref, conv_ref, stats_ref, col_ref):
    # xp_ref   : (H+2, W+2, Cin)    f32   zero-padded input, ONE image (N squeezed)
    # w_ref    : (KH*KW*Cin, Cout)  bf16  im2col-folded conv weight
    # conv_ref : (H*W, Cout)        f32   conv output for this image
    # stats_ref: (2, Cout)          f32   [sum, sum-of-squares] for this image
    # col_ref  : (H*W, KH*KW*Cin)   bf16  VMEM scratch (im2col matrix, MXU dtype)
    Hp, Wp, Cin = xp_ref.shape
    H, W = Hp - 2, Wp - 2

    xp = xp_ref[...]

    # Build the im2col matrix once: 9 shifted HxW views placed side by side,
    # cast to bf16 at store time (no second full-size copy).  One matmul with
    # K = 9*Cin instead of 9 matmuls with K = Cin + 9 full-size VPU adds.
    for dy in range(KH):
        for dx in range(KW):
            t = dy * KW + dx
            col_ref[:, t * Cin:(t + 1) * Cin] = (
                xp[dy:dy + H, dx:dx + W, :]
                .reshape(H * W, Cin)
                .astype(jnp.bfloat16))

    # bf16 MXU operands, f32 accumulation.
    acc = jnp.dot(col_ref[...], w_ref[...], preferred_element_type=jnp.float32)

    conv_ref[...] = acc

    # Single-pass partial BN statistics from the f32 accumulator
    # (finalized across the batch in the wrapper: var = E[x^2] - E[x]^2).
    stats_ref[0:1, :] = jnp.sum(acc, axis=0, keepdims=True)
    stats_ref[1:2, :] = jnp.sum(acc * acc, axis=0, keepdims=True)


# --------------------------------------------------------------------------
# Pass 2: fused BN affine (pre-folded scale/shift) + ReLU over row tiles.
# --------------------------------------------------------------------------
def bn_relu_kernel(conv_ref, scale_ref, shift_ref, out_ref):
    # conv_ref : (TR, Cout) f32, scale/shift : (1, Cout) f32 (broadcast rows)
    y = conv_ref[...] * scale_ref[...] + shift_ref[...]
    out_ref[...] = jnp.maximum(y, 0.0)


def _row_tile(n_rows, target=1024):
    """Largest row-block <= target that divides n_rows and keeps (8,128) rules."""
    if n_rows <= target:
        return n_rows
    for tr in range(target, 0, -8):      # multiples of 8, descending
        if n_rows % tr == 0:
            return tr
    return n_rows                         # fallback: full extent (always legal)


def conv_block(x_nchw, weight_oihw, gamma, beta):
    """ConvBlock.forward.  x_nchw: (N, Cin, H, W) -> (N, Cout, H, W)."""
    N, Cin, H, W = x_nchw.shape
    Cout = weight_oihw.shape[0]
    HW = H * W
    K = KH * KW * Cin

    # Glue (plain JAX): layout change, 1-px zero pad, weight fold to im2col form.
    x_nhwc = jnp.transpose(x_nchw, (0, 2, 3, 1)).astype(jnp.float32)
    xp = jnp.pad(x_nhwc, ((0, 0), (1, 1), (1, 1), (0, 0)))
    # (Cout,Cin,KH,KW) -> (KH,KW,Cin,Cout) -> (9*Cin, Cout), bf16 MXU operand.
    w_col = jnp.transpose(weight_oihw, (2, 3, 1, 0)).reshape(K, Cout)
    w_col = w_col.astype(jnp.bfloat16)

    cparams = pltpu.CompilerParams(
        dimension_semantics=("parallel",),        # both TCs on v7x split the grid
        vmem_limit_bytes=32 * 1024 * 1024,        # explicit, fits v5e/v6e/v7x
    )

    # ---- Pass 1: grid over batch; conv + per-image (sum, sumsq) ------------
    conv_out, stats = pl.pallas_call(
        conv_stats_kernel,
        grid=(N,),
        in_specs=[
            pl.BlockSpec((None, H + 2, W + 2, Cin), lambda n: (n, 0, 0, 0)),
            pl.BlockSpec((K, Cout), lambda n: (0, 0)),
        ],
        out_specs=(
            pl.BlockSpec((None, HW, Cout), lambda n: (n, 0, 0)),
            pl.BlockSpec((None, 2, Cout), lambda n: (n, 0, 0)),
        ),
        out_shape=(
            jax.ShapeDtypeStruct((N, HW, Cout), jnp.float32),
            jax.ShapeDtypeStruct((N, 2, Cout), jnp.float32),
        ),
        scratch_shapes=[pltpu.VMEM((HW, K), jnp.bfloat16)],
        compiler_params=cparams,
    )(xp, w_col)

    # ---- Global BN stats (tiny (2, Cout) reduction) + folded scale/shift ----
    total = jnp.sum(stats, axis=0)                       # (2, Cout)
    n_elems = float(N * HW)
    mean = total[0] / n_elems
    var = total[1] / n_elems - mean * mean               # biased variance
    inv_std = jax.lax.rsqrt(var + BN_EPS)
    g = gamma.astype(jnp.float32)
    b = beta.astype(jnp.float32)
    scale = (g * inv_std).reshape(1, Cout)
    shift = (b - mean * g * inv_std).reshape(1, Cout)

    # ---- Pass 2: grid over flattened rows; y = max(conv*scale + shift, 0) ---
    NHW = N * HW
    TR = _row_tile(NHW)
    conv_flat = conv_out.reshape(NHW, Cout)              # free (contiguous) reshape

    out_flat = pl.pallas_call(
        bn_relu_kernel,
        grid=(NHW // TR,),
        in_specs=[
            pl.BlockSpec((TR, Cout), lambda i: (i, 0)),
            pl.BlockSpec((1, Cout), lambda i: (0, 0)),
            pl.BlockSpec((1, Cout), lambda i: (0, 0)),
        ],
        out_specs=pl.BlockSpec((TR, Cout), lambda i: (i, 0)),
        out_shape=jax.ShapeDtypeStruct((NHW, Cout), jnp.float32),
        compiler_params=cparams,
    )(conv_flat, scale, shift)

    # NHWC (flattened spatial) -> NCHW.
    return jnp.transpose(out_flat.reshape(N, H, W, Cout), (0, 3, 1, 2))


def _reference(x_nchw, weight_oihw, gamma, beta):
    """Pure-JAX reference matching PyTorch ConvBlock.forward (train-mode BN)."""
    y = jax.lax.conv_general_dilated(
        x_nchw, weight_oihw,
        window_strides=(1, 1), padding=((1, 1), (1, 1)),
        dimension_numbers=("NCHW", "OIHW", "NCHW"),
    )
    mean = jnp.mean(y, axis=(0, 2, 3), keepdims=True)
    var = jnp.mean((y - mean) ** 2, axis=(0, 2, 3), keepdims=True)
    y = (y - mean) * jax.lax.rsqrt(var + BN_EPS)
    y = y * gamma.reshape(1, -1, 1, 1) + beta.reshape(1, -1, 1, 1)
    return jnp.maximum(y, 0.0)


if __name__ == "__main__":
    N, Cin, Cout, H, W = 2, 4, 8, 16, 16

    key = jax.random.PRNGKey(0)
    kx, kw = jax.random.split(key)

    x = jax.random.normal(kx, (N, Cin, H, W), dtype=jnp.float32)

    # Deterministic parameter init (mimics PyTorch defaults' scale):
    #   conv weight ~ U(-1/sqrt(fan_in), 1/sqrt(fan_in)), fan_in = Cin*KH*KW
    #   BN: gamma = 1, beta = 0 (running stats unused in train-mode forward)
    fan_in = Cin * KH * KW
    bound = 1.0 / math.sqrt(fan_in)
    weight = jax.random.uniform(
        kw, (Cout, Cin, KH, KW), dtype=jnp.float32, minval=-bound, maxval=bound
    )
    gamma = jnp.ones((Cout,), dtype=jnp.float32)
    beta = jnp.zeros((Cout,), dtype=jnp.float32)

    out = conv_block(x, weight, gamma, beta)
    out = jax.block_until_ready(out)

    ref = _reference(x, weight, gamma, beta)
    assert out.shape == (N, Cout, H, W)
    max_err = float(jnp.max(jnp.abs(out - ref)))
    assert max_err < 2e-2, "mismatch vs reference: max abs diff = %e" % max_err

    print("KERNEL_OK")
</pallas_src>

<mosaic_0001>
module attributes {stable_mosaic.version = 11 : i64} {
  func.func @conv_stats_kernel(%arg0: i32, %arg1: memref<1x18x18x4xf32, #tpu.memory_space<vmem>>, %arg2: memref<36x8xbf16, #tpu.memory_space<vmem>>, %arg3: memref<1x256x8xf32, #tpu.memory_space<vmem>>, %arg4: memref<1x2x8xf32, #tpu.memory_space<vmem>>, %arg5: memref<256x36xbf16, #tpu.memory_space<vmem>>) attributes {dimension_semantics = [#tpu.dimension_semantics<parallel>], iteration_bounds = array<i64: 2>, scalar_prefetch = 0 : i64, scratch_operands = 1 : i64, tpu.core_type = #tpu.core_type<tc>, window_params = [{transform_indices = @transform_0, window_bounds = array<i64: 1, 18, 18, 4>}, {pipeline_mode = #tpu.pipeline_mode<synchronous>, transform_indices = @transform_1, window_bounds = array<i64: 36, 8>}, {transform_indices = @transform_2, window_bounds = array<i64: 1, 256, 8>}, {transform_indices = @transform_3, window_bounds = array<i64: 1, 2, 8>}]} {
    %c0 = arith.constant 0 : index
    %c0_0 = arith.constant 0 : index
    %c0_1 = arith.constant 0 : index
    %c0_2 = arith.constant 0 : index
    %0 = vector.load %arg1[%c0, %c0_0, %c0_1, %c0_2] : memref<1x18x18x4xf32, #tpu.memory_space<vmem>>, vector<1x18x18x4xf32>
    %1 = vector.shape_cast %0 : vector<1x18x18x4xf32> to vector<18x18x4xf32>
    %2 = vector.extract_strided_slice %1 {offsets = [0, 0, 0], sizes = [16, 16, 4], strides = [1, 1, 1]} : vector<18x18x4xf32> to vector<16x16x4xf32>
    %3 = vector.shape_cast %2 : vector<16x16x4xf32> to vector<256x4xf32>
    %4 = arith.truncf %3 : vector<256x4xf32> to vector<256x4xbf16>
    %c0_3 = arith.constant 0 : index
    %c0_4 = arith.constant 0 : index
    %5 = vector.load %arg5[%c0_3, %c0_4] : memref<256x36xbf16, #tpu.memory_space<vmem>>, vector<256x4xbf16>
    tpu.vector_store %arg5[%c0_3, %c0_4], %4 {strides = array<i32>} : memref<256x36xbf16, #tpu.memory_space<vmem>>, vector<256x4xbf16>,
    %6 = vector.extract_strided_slice %1 {offsets = [0, 1, 0], sizes = [16, 16, 4], strides = [1, 1, 1]} : vector<18x18x4xf32> to vector<16x16x4xf32>
    %7 = vector.shape_cast %6 : vector<16x16x4xf32> to vector<256x4xf32>
    %8 = arith.truncf %7 : vector<256x4xf32> to vector<256x4xbf16>
    %c0_5 = arith.constant 0 : index
    %c4 = arith.constant 4 : index
    %9 = vector.load %arg5[%c0_5, %c4] : memref<256x36xbf16, #tpu.memory_space<vmem>>, vector<256x4xbf16>
    tpu.vector_store %arg5[%c0_5, %c4], %8 {strides = array<i32>} : memref<256x36xbf16, #tpu.memory_space<vmem>>, vector<256x4xbf16>,
    %10 = vector.extract_strided_slice %1 {offsets = [0, 2, 0], sizes = [16, 16, 4], strides = [1, 1, 1]} : vector<18x18x4xf32> to vector<16x16x4xf32>
    %11 = vector.shape_cast %10 : vector<16x16x4xf32> to vector<256x4xf32>
    %12 = arith.truncf %11 : vector<256x4xf32> to vector<256x4xbf16>
    %c0_6 = arith.constant 0 : index
    %c8 = arith.constant 8 : index
    %13 = vector.load %arg5[%c0_6, %c8] : memref<256x36xbf16, #tpu.memory_space<vmem>>, vector<256x4xbf16>
    tpu.vector_store %arg5[%c0_6, %c8], %12 {strides = array<i32>} : memref<256x36xbf16, #tpu.memory_space<vmem>>, vector<256x4xbf16>,
    %14 = vector.extract_strided_slice %1 {offsets = [1, 0, 0], sizes = [16, 16, 4], strides = [1, 1, 1]} : vector<18x18x4xf32> to vector<16x16x4xf32>
    %15 = vector.shape_cast %14 : vector<16x16x4xf32> to vector<256x4xf32>
    %16 = arith.truncf %15 : vector<256x4xf32> to vector<256x4xbf16>
    %c0_7 = arith.constant 0 : index
    %c12 = arith.constant 12 : index
    %17 = vector.load %arg5[%c0_7, %c12] : memref<256x36xbf16, #tpu.memory_space<vmem>>, vector<256x4xbf16>
    tpu.vector_store %arg5[%c0_7, %c12], %16 {strides = array<i32>} : memref<256x36xbf16, #tpu.memory_space<vmem>>, vector<256x4xbf16>,
    %18 = vector.extract_strided_slice %1 {offsets = [1, 1, 0], sizes = [16, 16, 4], strides = [1, 1, 1]} : vector<18x18x4xf32> to vector<16x16x4xf32>
    %19 = vector.shape_cast %18 : vector<16x16x4xf32> to vector<256x4xf32>
    %20 = arith.truncf %19 : vector<256x4xf32> to vector<256x4xbf16>
    %c0_8 = arith.constant 0 : index
    %c16 = arith.constant 16 : index
    %21 = vector.load %arg5[%c0_8, %c16] : memref<256x36xbf16, #tpu.memory_space<vmem>>, vector<256x4xbf16>
    tpu.vector_store %arg5[%c0_8, %c16], %20 {strides = array<i32>} : memref<256x36xbf16, #tpu.memory_space<vmem>>, vector<256x4xbf16>,
    %22 = vector.extract_strided_slice %1 {offsets = [1, 2, 0], sizes = [16, 16, 4], strides = [1, 1, 1]} : vector<18x18x4xf32> to vector<16x16x4xf32>
    %23 = vector.shape_cast %22 : vector<16x16x4xf32> to vector<256x4xf32>
    %24 = arith.truncf %23 : vector<256x4xf32> to vector<256x4xbf16>
    %c0_9 = arith.constant 0 : index
    %c20 = arith.constant 20 : index
    %25 = vector.load %arg5[%c0_9, %c20] : memref<256x36xbf16, #tpu.memory_space<vmem>>, vector<256x4xbf16>
    tpu.vector_store %arg5[%c0_9, %c20], %24 {strides = array<i32>} : memref<256x36xbf16, #tpu.memory_space<vmem>>, vector<256x4xbf16>,
    %26 = vector.extract_strided_slice %1 {offsets = [2, 0, 0], sizes = [16, 16, 4], strides = [1, 1, 1]} : vector<18x18x4xf32> to vector<16x16x4xf32>
    %27 = vector.shape_cast %26 : vector<16x16x4xf32> to vector<256x4xf32>
    %28 = arith.truncf %27 : vector<256x4xf32> to vector<256x4xbf16>
    %c0_10 = arith.constant 0 : index
    %c24 = arith.constant 24 : index
    %29 = vector.load %arg5[%c0_10, %c24] : memref<256x36xbf16, #tpu.memory_space<vmem>>, vector<256x4xbf16>
    tpu.vector_store %arg5[%c0_10, %c24], %28 {strides = array<i32>} : memref<256x36xbf16, #tpu.memory_space<vmem>>, vector<256x4xbf16>,
    %30 = vector.extract_strided_slice %1 {offsets = [2, 1, 0], sizes = [16, 16, 4], strides = [1, 1, 1]} : vector<18x18x4xf32> to vector<16x16x4xf32>
    %31 = vector.shape_cast %30 : vector<16x16x4xf32> to vector<256x4xf32>
    %32 = arith.truncf %31 : vector<256x4xf32> to vector<256x4xbf16>
    %c0_11 = arith.constant 0 : index
    %c28 = arith.constant 28 : index
    %33 = vector.load %arg5[%c0_11, %c28] : memref<256x36xbf16, #tpu.memory_space<vmem>>, vector<256x4xbf16>
    tpu.vector_store %arg5[%c0_11, %c28], %32 {strides = array<i32>} : memref<256x36xbf16, #tpu.memory_space<vmem>>, vector<256x4xbf16>,
    %34 = vector.extract_strided_slice %1 {offsets = [2, 2, 0], sizes = [16, 16, 4], strides = [1, 1, 1]} : vector<18x18x4xf32> to vector<16x16x4xf32>
    %35 = vector.shape_cast %34 : vector<16x16x4xf32> to vector<256x4xf32>
    %36 = arith.truncf %35 : vector<256x4xf32> to vector<256x4xbf16>
    %c0_12 = arith.constant 0 : index
    %c32 = arith.constant 32 : index
    %37 = vector.load %arg5[%c0_12, %c32] : memref<256x36xbf16, #tpu.memory_space<vmem>>, vector<256x4xbf16>
    tpu.vector_store %arg5[%c0_12, %c32], %36 {strides = array<i32>} : memref<256x36xbf16, #tpu.memory_space<vmem>>, vector<256x4xbf16>,
    %c0_13 = arith.constant 0 : index
    %c0_14 = arith.constant 0 : index
    %38 = vector.load %arg5[%c0_13, %c0_14] : memref<256x36xbf16, #tpu.memory_space<vmem>>, vector<256x36xbf16>
    %c0_15 = arith.constant 0 : index
    %c0_16 = arith.constant 0 : index
    %39 = vector.load %arg2[%c0_15, %c0_16] : memref<36x8xbf16, #tpu.memory_space<vmem>>, vector<36x8xbf16>
    %cst = arith.constant dense<0.000000e+00> : vector<256x8xf32>
    %40 = tpu.matmul %38, %39, %cst {dimension_numbers = #tpu.dot_dimension_numbers<[1], [0], [0], [1], [0, 0, 1, 1], [], []>} : vector<256x36xbf16>, vector<36x8xbf16>, vector<256x8xf32> -> vector<256x8xf32>
    %c0_17 = arith.constant 0 : index
    %c0_18 = arith.constant 0 : index
    %c0_19 = arith.constant 0 : index
    %41 = vector.load %arg3[%c0_17, %c0_18, %c0_19] : memref<1x256x8xf32, #tpu.memory_space<vmem>>, vector<1x256x8xf32>
    %42 = vector.shape_cast %41 : vector<1x256x8xf32> to vector<256x8xf32>
    %43 = vector.shape_cast %40 : vector<256x8xf32> to vector<1x256x8xf32>
    tpu.vector_store %arg3[%c0_17, %c0_18, %c0_19], %43 {strides = array<i32>} : memref<1x256x8xf32, #tpu.memory_space<vmem>>, vector<1x256x8xf32>,
    %cst_20 = arith.constant dense<0.000000e+00> : vector<8xf32>
    %44 = vector.multi_reduction <add>, %40, %cst_20 [0] : vector<256x8xf32> to vector<8xf32>
    %45 = vector.shape_cast %44 : vector<8xf32> to vector<1x8xf32>
    %c0_21 = arith.constant 0 : index
    %c0_22 = arith.constant 0 : index
    %c0_23 = arith.constant 0 : index
    %46 = vector.load %arg4[%c0_21, %c0_22, %c0_23] : memref<1x2x8xf32, #tpu.memory_space<vmem>>, vector<1x1x8xf32>
    %47 = vector.shape_cast %46 : vector<1x1x8xf32> to vector<1x8xf32>
    %48 = vector.shape_cast %45 : vector<1x8xf32> to vector<1x1x8xf32>
    tpu.vector_store %arg4[%c0_21, %c0_22, %c0_23], %48 {strides = array<i32>} : memref<1x2x8xf32, #tpu.memory_space<vmem>>, vector<1x1x8xf32>,
    %49 = arith.mulf %40, %40 : vector<256x8xf32>
    %cst_24 = arith.constant dense<0.000000e+00> : vector<8xf32>
    %50 = vector.multi_reduction <add>, %49, %cst_24 [0] : vector<256x8xf32> to vector<8xf32>
    %51 = vector.shape_cast %50 : vector<8xf32> to vector<1x8xf32>
    %c0_25 = arith.constant 0 : index
    %c1 = arith.constant 1 : index
    %c0_26 = arith.constant 0 : index
    %52 = vector.load %arg4[%c0_25, %c1, %c0_26] : memref<1x2x8xf32, #tpu.memory_space<vmem>>, vector<1x1x8xf32>
    %53 = vector.shape_cast %52 : vector<1x1x8xf32> to vector<1x8xf32>
    %54 = vector.shape_cast %51 : vector<1x8xf32> to vector<1x1x8xf32>
    tpu.vector_store %arg4[%c0_25, %c1, %c0_26], %54 {strides = array<i32>} : memref<1x2x8xf32, #tpu.memory_space<vmem>>, vector<1x1x8xf32>,
    return
  }
  func.func @transform_0(%arg0: i32) -> (i32, i32, i32, i32) {
    %c0_i32 = arith.constant 0 : i32
    %c0_i32_0 = arith.constant 0 : i32
    %c0_i32_1 = arith.constant 0 : i32
    %c0_i32_2 = arith.constant 0 : i32
    return %arg0, %c0_i32, %c0_i32_0, %c0_i32_1 : i32, i32, i32, i32
  }
  func.func @transform_1(%arg0: i32) -> (i32, i32) {
    %c0_i32 = arith.constant 0 : i32
    %c0_i32_0 = arith.constant 0 : i32
    %c0_i32_1 = arith.constant 0 : i32
    return %c0_i32, %c0_i32_0 : i32, i32
  }
  func.func @transform_2(%arg0: i32) -> (i32, i32, i32) {
    %c0_i32 = arith.constant 0 : i32
    %c0_i32_0 = arith.constant 0 : i32
    %c0_i32_1 = arith.constant 0 : i32
    return %arg0, %c0_i32, %c0_i32_0 : i32, i32, i32
  }
  func.func @transform_3(%arg0: i32) -> (i32, i32, i32) {
    %c0_i32 = arith.constant 0 : i32
    %c0_i32_0 = arith.constant 0 : i32
    %c0_i32_1 = arith.constant 0 : i32
    return %arg0, %c0_i32, %c0_i32_0 : i32, i32, i32
  }
}

</mosaic_0001>

<bundles_post_ra>
// kernel: tpu_custom_call.1
= control target key start
LH: loop header
LB: loop body
LE: loop exit
PB: predicated region body
PF: predicated region fallthrough
CT: control target
= control target key end

     0   :  { %9 = vsyncpa [#allocation4], 0  ;;  %s4403_s0 = inlined_call_operand.vmem [shape: f32[2,18,18,4], index: 0, kind: input, shape index: {}]   ;;  %s4404_s1 = inlined_call_operand.vmem [shape: bf16[36,8], index: 1, kind: input, shape index: {}]   ;;  %s4405_s2 = inlined_call_operand.vmem [shape: f32[2,256,8], index: 2, kind: output, shape index: {0}]   ;;  %s4406_s3 = inlined_call_operand.hbm [shape: f32[2,2,8], index: 3, kind: output, shape index: {1}]  }
   0x1   :  { %11 = vsyncpa [#allocation4 + $0x1], 0  ;;  %s2680_s12 = smov 0   ;;  %s2682_s13 = smov 0  }
   0x2   :  { %s2684_s14 = smov 0   ;;  %s2686_s15 = smov 0  }
   0x3 LB: > { %s2701_s16 = sadd.s32 4294967295, %s2650_s15   ;;  %s2412_s17 = sadd.s32 4294967294, %s2650_s15   ;;  %s2650_s15 = sphi %s2686_s15, %s4627_s15   ;;  %s2646_s14 = sphi %s2684_s14, %s4626_s14   ;;  %s2642_s13 = sphi %s2682_s13, %s4625_s13   ;;  %s2638_s12 = sphi %s2680_s12, %s4624_s12  }
   0x4   : > { %s2705_s18 = sadd.s32 1, %s2650_s15   ;;  %s97_s19 = sadd.s32 1, %s2646_s14 }
   0x5   : > { %s94_s20 = ssub.s32 %s2650_s15, %s2705_s18  ;;  %p107_p0 = scmp.ne.s32.totalorder %s2646_s14, %s2642_s13 }
   0x6   : > { %p95_p1 = scmp.eq.s32.totalorder %s94_s20, 0  ;;  %p108_p2 = scmp.eq.s32.totalorder %s2701_s16, 1 }
   0x7   : > { %p113_p3 = scmp.ne.s32.totalorder %s2642_s13, %s2638_s12  ;;  %p114_p4 = scmp.eq.s32.totalorder %s2412_s17, 1 }
   0x8   : > { %s2716_s21 = scalar_select %p95_p1, %s2646_s14, %s97_s19  }
   0x9   : > { %p2718_p5 = por %p108_p2, %p107_p0  ;;  %p2722_p6 = por %p114_p4, %p113_p3 }
   0xa   : > { %p2415_p7 = scmp.ge.s32.totalorder %s2650_s15, 1  ;;  %p143_p8 = scmp.lt.s32.totalorder %s2650_s15, 3 }
   0xc   : > { %p144_p9 = pnand %p2415_p7, %p143_p8 }
   0xe   : > { %147 = sbr.rel (%p144_p9) target bundleno = 996 (0x3e4), region = 28 }
  0x13   : > { %p172_p10 = scmp.lt.s32.totalorder %s2701_s16, 1  ;;  %vm350_vm0 = vcmask 1046528   ;;  %s2652_s29 = smov 4   ;;  %vm656_vm1 = vcmask 1045504   ;;  %vm269_vm2 = vcmask 27648   ;;  %vm623_vm3 = vcmask 60448  }
  0x14   : > { %s2653_s30 = smov 8   ;;  %s2654_s4 = smov 12   ;;  %vm929_vm4 = vcmask 93248   ;;  %vm1092_vm5 = vcmask 126048   ;;  %vm1235_vm6 = vcmask 158848   ;;  %vm1375_vm7 = vcmask 191648  }
  0x15   : > { %s2730_s24 = scalar_select %p172_p10, %s2701_s16, 1  ;;  %vm1508_vm8 = vcmask 224448   ;;  %vm2005_vm9 = vcmask 1041408   ;;  %vm1651_vm10 = vcmask 257248   ;;  %vm1791_vm11 = vcmask 290048  }
  0x16   : > { %s2655_s5 = smov 16   ;;  %s2656_s6 = smov 20   ;;  %vm1956_vm12 = vcmask 293888   ;;  %vm2098_vm13 = vcmask 64512   ;;  %vm2200_vm14 = vcmask 57344  }
  0x17   : > { %s2540_s25 = smul.u32 432, %s2730_s24  ;;  %s2657_s7 = smov 24  }
  0x18   : > { %s2658_s8 = smov 28   ;;  %s2659_s9 = smov 32  }
  0x19   : > { %s2736_s28 = scalar_lea.vmem %s4403_s0, %s2540_s25  ;;  %s2512_s26 = sshll.u32 %s2730_s24, 8 }
  0x1a   : > { %v2739_v0 = vld [vmem:[%s2736_s28 + $0x18] sm:$0xff]  ;;  %v2742_v1 = vld [vmem:[%s2736_s28 + $0x20] sm:$0xff]  ;;  %v2750_v5 = vld [vmem:[%s2736_s28 + $0x8] sm:$0xff]  ;;  %s169_s24 = sand.u32 1, %s2642_s13   ;;  %s2608_s25 = scalar_lea.hbm %s4406_s3, 4 }
  0x1b   : > { %v2745_v2 = vld [vmem:[%s2736_s28] sm:$0xff]  ;;  %v356_v3 = vrot.slane %v2739_v0, 1  ;;  %v357_v4 = vrot.slane %v2742_v1, 1  ;;  %v2754_v7 = vld [vmem:[%s2736_s28 + $0x28] sm:$0x3]  ;;  %v352_v8 = vrot.slane %v2750_v5, 1 }
  0x1c   : > { %v351_v6 = vrot.slane %v2745_v2, 1  ;;  %v2758_v9 = vld [vmem:[%s2736_s28 + $0x10] sm:$0x3]  ;;  %v359_v11 = vrot.slane %v2754_v7, 1  ;;  %v2770_v16 = vld [vmem:[%s2736_s28 + $0x38] sm:$0xff]  ;;  %v2789_v25 = vld [vmem:[%s2736_s28 + $0x48] sm:$0xff] }
  0x1d   : > { %v358_v10 = vsel %vm350_vm0, %v356_v3, %v357_v4  ;;  %v2763_v12 = vld [vmem:[%s2736_s28 + $0x30] sm:$0xff]  ;;  %v354_v15 = vrot.slane %v2758_v9, 1  ;;  %v2776_v19 = vld [vmem:[%s2736_s28 + $0x40] sm:$0x3]  ;;  %v362_v21 = vrot.slane %v2770_v16, 1  ;;  %v366_v33 = vrot.slane %v2789_v25, 1 }
  0x1e   : > { %v2765_v13 = vpack.c.bf16 %v358_v10, %v358_v10  ;;  %v353_v14 = vsel %vm350_vm0, %v351_v6, %v352_v8  ;;  %v361_v18 = vrot.slane %v2763_v12, 1  ;;  %v360_v20 = vsel %vm350_vm0, %v357_v4, %v359_v11  ;;  %v2783_v23 = vld [vmem:[%s2736_s28 + $0x50] sm:$0xff]  ;;  %v2786_v24 = vld [vmem:[%s2736_s28 + $0x58] sm:$0x3]  ;;  %v2806_v35 = vld [vmem:[%s2736_s28 + $0x60] sm:$0xff] }
  0x1f   : > { %v463_v17 = vpack.c.bf16 %v353_v14, %v353_v14  ;;  %v355_v22 = vsel %vm350_vm0, %v352_v8, %v354_v15  ;;  %v364_v27 = vrot.slane %v2776_v19, 1  ;;  %v2793_v28 = vpack.c.bf16 %v360_v20, %v360_v20  ;;  %v2812_v38 = vld [vmem:[%s2736_s28 + $0x78] sm:$0xff]  ;;  %v2815_v39 = vld [vmem:[%s2736_s28 + $0x80] sm:$0xff]  ;;  %v2818_v40 = vld [vmem:[%s2736_s28 + $0x68] sm:$0xff] }
  0x20   : > { %4501 = vst [vmem:[#allocation6_spill] sm:$0xff] %v2765_v13  ;;  %531 = vrot.lane.b32.xlu1 %v2765_v13, %s2652_s29  ;;  %v363_v26 = vsel %vm350_vm0, %v361_v18, %v362_v21  ;;  %v464_v30 = vpack.c.bf16 %v355_v22, %v355_v22  ;;  %v367_v31 = vrot.slane %v2783_v23, 1  ;;  %v369_v32 = vrot.slane %v2786_v24, 1  ;;  %v2823_v42 = vld [vmem:[%s2736_s28 + $0x70] sm:$0x3]  ;;  %v2847_v54 = vld [vmem:[%s2736_s28 + $0x98] sm:$0xff] }
  0x21   : > { %527 = vrot.lane.b32.xlu0 %v463_v17, %s2652_s29  ;;  %v2795_v29 = vpack.c.bf16 %v363_v26, %v363_v26  ;;  %v365_v34 = vsel %vm350_vm0, %v362_v21, %v364_v27  ;;  %v371_v43 = vrot.slane %v2806_v35, 1  ;;  %v376_v46 = vrot.slane %v2812_v38, 1  ;;  %v2840_v51 = vld [vmem:[%s2736_s28 + $0x88] sm:$0x3]  ;;  %v2850_v55 = vld [vmem:[%s2736_s28 + $0xa0] sm:$0x3] }
  0x22   : > { %v370_v36 = vsel %vm350_vm0, %v367_v31, %v369_v32  ;;  %v368_v37 = vsel %vm350_vm0, %v366_v33, %v367_v31  ;;  %v2820_v41 = vpack.c.bf16 %v365_v34, %v365_v34  ;;  %v377_v47 = vrot.slane %v2815_v39, 1  ;;  %v2855_v57 = vld [vmem:[%s2736_s28 + $0x90] sm:$0xff]  ;;  %v2871_v4 = vld [vmem:[%s2736_s28 + $0xa8] sm:$0xff]  ;;  %v2878_v10 = vld [vmem:[%s2736_s28 + $0xc0] sm:$0xff] }
  0x23   : > { %4502 = vst [vmem:[#allocation7_spill] sm:$0xff] %v2795_v29  ;;  %535 = vrot.lane.b32.xlu2 %v2795_v29, %s2652_s29  ;;  %v2826_v44 = vpack.c.bf16 %v370_v36, %v370_v36  ;;  %v2828_v45 = vpack.c.bf16 %v368_v37, %v368_v37  ;;  %v372_v48 = vrot.slane %v2818_v40, 1  ;;  %v374_v49 = vrot.slane %v2823_v42, 1  ;;  %v2881_v11 = vld [vmem:[%s2736_s28 + $0xc8] sm:$0xff]  ;;  %v2884_v14 = vld [vmem:[%s2736_s28 + $0xb0] sm:$0xff]  ;;  %v2913_v36 = vld [vmem:[%s2736_s28 + $0xe0] sm:$0xff] }
  0x24   : > { %4503 = vst [vmem:[#allocation8_spill] sm:$0xff] %v2820_v41  ;;  %v378_v52 = vsel %vm350_vm0, %v376_v46, %v377_v47  ;;  %v379_v58 = vrot.slane %v2840_v51, 1  ;;  %v382_v61 = vrot.slane %v2847_v54, 1  ;;  %v384_v62 = vrot.slane %v2850_v55, 1  ;;  %v2889_v17 = vld [vmem:[%s2736_s28 + $0xb8] sm:$0x3] }
  0x25   : > { %4504 = vst [vmem:[#allocation9_spill] sm:$0xff] %v2826_v44  ;;  %v373_v50 = vsel %vm350_vm0, %v371_v43, %v372_v48  ;;  %v375_v53 = vsel %vm350_vm0, %v372_v48, %v374_v49  ;;  %v2858_v59 = vpack.c.bf16 %v378_v52, %v378_v52  ;;  %v381_v63 = vrot.slane %v2855_v57, 1  ;;  %v2906_v32 = vld [vmem:[%s2736_s28 + $0xd0] sm:$0x3]  ;;  %v2916_v37 = vld [vmem:[%s2736_s28 + $0xe8] sm:$0x3] }
  0x26   : > { %4505 = vst [vmem:[#allocation10_spill] sm:$0xff] %v2828_v45  ;;  %v2852_v56 = vpack.c.bf16 %v373_v50, %v373_v50  ;;  %v2860_v60 = vpack.c.bf16 %v375_v53, %v375_v53  ;;  %v380_v3 = vsel %vm350_vm0, %v377_v47, %v379_v58  ;;  %v385_v6 = vsel %vm350_vm0, %v382_v61, %v384_v62  ;;  %v2921_v46 = vld [vmem:[%s2736_s28 + $0xd8] sm:$0xff] }
  0x27   : > { %4507 = vst [vmem:[#allocation12_spill] sm:$0xff] %v2858_v59  ;;  %v383_v8 = vsel %vm350_vm0, %v381_v63, %v382_v61  ;;  %v2886_v15 = vpack.c.bf16 %v380_v3, %v380_v3  ;;  %v386_v18 = vrot.slane %v2871_v4, 1  ;;  %v2892_v20 = vpack.c.bf16 %v385_v6, %v385_v6  ;;  %v2937_v61 = vld [vmem:[%s2736_s28 + $0xf0] sm:$0xff]  ;;  %v2944_v3 = vld [vmem:[%s2736_s28 + $0x108] sm:$0xff] }
  0x28   : > { %533 = vrot.lane.b32.xlu1 %v2793_v28, %s2652_s29  ;;  %4506 = vst [vmem:[#allocation11_spill] sm:$0xff] %v2852_v56  ;;  %v2894_v21 = vpack.c.bf16 %v383_v8, %v383_v8  ;;  %v391_v22 = vrot.slane %v2878_v10, 1  ;;  %v392_v26 = vrot.slane %v2881_v11, 1  ;;  %v387_v27 = vrot.slane %v2884_v14, 1  ;;  %v2947_v6 = vld [vmem:[%s2736_s28 + $0x110] sm:$0xff]  ;;  %v2950_v8 = vld [vmem:[%s2736_s28 + $0xf8] sm:$0xff] }
  0x29   : > { %529 = vrot.lane.b32.xlu0 %v464_v30, %s2652_s29  ;;  %4508 = vst [vmem:[#allocation13_spill] sm:$0xff] %v2860_v60  ;;  %v389_v30 = vrot.slane %v2889_v17, 1  ;;  %v394_v47 = vrot.slane %v2906_v32, 1  ;;  %v397_v50 = vrot.slane %v2913_v36, 1  ;;  %v399_v52 = vrot.slane %v2916_v37, 1 }
  0x2a   : > { %4509 = vst [vmem:[#allocation14_spill] sm:$0xff] %v2886_v15  ;;  %v388_v31 = vsel %vm350_vm0, %v386_v18, %v387_v27  ;;  %v393_v33 = vsel %vm350_vm0, %v391_v22, %v392_v26  ;;  %v396_v53 = vrot.slane %v2921_v46, 1  ;;  %v2955_v22 = vld [vmem:[%s2736_s28 + $0x100] sm:$0x3] }
  0x2b   : > { %537 = vrot.lane.b32.xlu2 %v2820_v41, %s2652_s29  ;;  %4510 = vst [vmem:[#allocation15_spill] sm:$0xff] %v2892_v20  ;;  %v390_v34 = vsel %vm350_vm0, %v387_v27, %v389_v30  ;;  %v2918_v43 = vpack.c.bf16 %v388_v31, %v388_v31  ;;  %v2924_v48 = vpack.c.bf16 %v393_v33, %v393_v33  ;;  %v406_v31 = vrot.slane %v2944_v3, 1 }
  0x2c   : > { %4511 = vst [vmem:[#allocation16_spill] sm:$0xff] %v2894_v21  ;;  %v2926_v49 = vpack.c.bf16 %v390_v34, %v390_v34  ;;  %v395_v58 = vsel %vm350_vm0, %v392_v26, %v394_v47  ;;  %v400_v62 = vsel %vm350_vm0, %v397_v50, %v399_v52  ;;  %v398_v63 = vsel %vm350_vm0, %v396_v53, %v397_v50  ;;  %v2972_v52 = vld [vmem:[%s2736_s28 + $0x118] sm:$0x3] }
  0x2d   : > { %4512 = vst [vmem:[#allocation17_spill] sm:$0xff] %v2918_v43  ;;  %v2952_v18 = vpack.c.bf16 %v395_v58, %v395_v58  ;;  %v401_v26 = vrot.slane %v2937_v61, 1  ;;  %v2958_v27 = vpack.c.bf16 %v400_v62, %v400_v62  ;;  %v2960_v30 = vpack.c.bf16 %v398_v63, %v398_v63  ;;  %v2979_v62 = vld [vmem:[%s2736_s28 + $0x128] sm:$0xff]  ;;  %v2982_v63 = vld [vmem:[%s2736_s28 + $0x130] sm:$0x3] }
  0x2e   : > { %4513 = vst [vmem:[#allocation18_spill] sm:$0xff] %v2924_v48  ;;  %v407_v33 = vrot.slane %v2947_v6, 1  ;;  %v402_v34 = vrot.slane %v2950_v8, 1  ;;  %v404_v47 = vrot.slane %v2955_v22, 1 }
  0x2f   : > { %4514 = vst [vmem:[#allocation19_spill] sm:$0xff] %v2926_v49 }
  0x30   : > { %541 = vrot.lane.b32.xlu1 %v2826_v44, %s2652_s29  ;;  %4515 = vst [vmem:[#allocation20_spill] sm:$0xff] %v2952_v18  ;;  %v403_v50 = vsel %vm350_vm0, %v401_v26, %v402_v34  ;;  %v408_v53 = vsel %vm350_vm0, %v406_v31, %v407_v33  ;;  %v405_v58 = vsel %vm350_vm0, %v402_v34, %v404_v47  ;;  %v2987_v26 = vld [vmem:[%s2736_s28 + $0x120] sm:$0xff]  ;;  %v412_v31 = vrot.slane %v2979_v62, 1 }
  0x31   : > { %539 = vrot.lane.b32.xlu0 %v2828_v45, %s2652_s29  ;;  %4516 = vst [vmem:[#allocation21_spill] sm:$0xff] %v2958_v27  ;;  %v414_v34 = vrot.slane %v2982_v63, 1  ;;  %v411_v47 = vrot.slane %v2987_v26, 1  ;;  %v657_v45 = vrot.slane %v2745_v2, 2 }
  0x32   : > { %4517 = vst [vmem:[#allocation22_spill] sm:$0xff] %v2960_v30 }
  0x33   : > { %543 = vrot.lane.b32.xlu2 %v2852_v56, %s2652_s29  ;;  %v3045_v56 = vld [vmem:[%s2736_s28 + $0x170] sm:$0xff] }
  0x38   : > { %547 = vrot.lane.b32.xlu1 %v2858_v59, %s2652_s29 }
  0x39   : > { %545 = vrot.lane.b32.xlu0 %v2860_v60, %s2652_s29  ;;  %v3048_v60 = vld [vmem:[%s2736_s28 + $0x178] sm:$0x3] }
  0x3b   : > { %549 = vrot.lane.b32.xlu2 %v2886_v15, %s2652_s29 }
  0x40   : > { %553 = vrot.lane.b32.xlu1 %v2892_v20, %s2652_s29  ;;  %v3013_v20 = vld [vmem:[%s2736_s28 + $0x158] sm:$0xff] }
  0x41   : > { %551 = vrot.lane.b32.xlu0 %v2894_v21, %s2652_s29 }
  0x43   : > { %555 = vrot.lane.b32.xlu2 %v2918_v43, %s2652_s29  ;;  %v3003_v43 = vld [vmem:[%s2736_s28 + $0x138] sm:$0xff] }
  0x48   : > { %559 = vrot.lane.b32.xlu1 %v2924_v48, %s2652_s29  ;;  %v2990_v48 = vpack.c.bf16 %v408_v53, %v408_v53  ;;  %v415_v53 = vsel %vm350_vm0, %v412_v31, %v414_v34 }
  0x49   : > { %557 = vrot.lane.b32.xlu0 %v2926_v49, %s2652_s29  ;;  %v3010_v49 = vld [vmem:[%s2736_s28 + $0x150] sm:$0xff] }
  0x4a   : > { %4519 = vst [vmem:[#allocation24_spill] sm:$0xff] %v2990_v48 }
  0x4b   : > { %561 = vrot.lane.b32.xlu2 %v2952_v18, %s2652_s29  ;;  %v2984_v18 = vpack.c.bf16 %v403_v50, %v403_v50 }
  0x4d   : > { %4518 = vst [vmem:[#allocation23_spill] sm:$0xff] %v2984_v18 }
  0x50   : > { %565 = vrot.lane.b32.xlu1 %v2958_v27, %s2652_s29  ;;  %v409_v27 = vrot.slane %v2972_v52, 1 }
  0x51   : > { %563 = vrot.lane.b32.xlu0 %v2960_v30, %s2652_s29  ;;  %v2992_v30 = vpack.c.bf16 %v405_v58, %v405_v58  ;;  %v413_v58 = vsel %vm350_vm0, %v411_v47, %v412_v31  ;;  %v421_v31 = vrot.slane %v3010_v49, 1  ;;  %v422_v47 = vrot.slane %v3013_v20, 1 }
  0x52   : > { %v410_v50 = vsel %vm350_vm0, %v407_v33, %v409_v27  ;;  %v3021_v33 = vld [vmem:[%s2736_s28 + $0x148] sm:$0x3]  ;;  %v3026_v34 = vpack.c.bf16 %v413_v58, %v413_v58 }
  0x53   : > { %4520 = vst [vmem:[#allocation25_spill] sm:$0xff] %v2992_v30  ;;  %567 = vrot.lane.b32.xlu2 %v2984_v18, %s2652_s29  ;;  %v3016_v18 = vld [vmem:[%s2736_s28 + $0x140] sm:$0xff]  ;;  %v3018_v27 = vpack.c.bf16 %v410_v50, %v410_v50  ;;  %v419_v50 = vrot.slane %v3021_v33, 1  ;;  %v423_v58 = vsel %vm350_vm0, %v421_v31, %v422_v47  ;;  %v429_v31 = vrot.slane %v3048_v60, 1 }
  0x54   : > { %4523 = vst [vmem:[#allocation28_spill] sm:$0xff] %v3026_v34  ;;  %v417_v15 = vrot.slane %v3016_v18, 1 }
  0x55   : > { %4521 = vst [vmem:[#allocation26_spill] sm:$0xff] %v3018_v27 }
  0x56   : > { %v420_v59 = vsel %vm350_vm0, %v417_v15, %v419_v50 }
  0x57   : > { %v3058_v41 = vpack.c.bf16 %v420_v59, %v420_v59 }
  0x58   : > { %571 = vrot.lane.b32.xlu1 %v2990_v48, %s2652_s29  ;;  %v416_v48 = vrot.slane %v3003_v43, 1 }
  0x59   : > { %569 = vrot.lane.b32.xlu0 %v2992_v30, %s2652_s29  ;;  %v3024_v30 = vpack.c.bf16 %v415_v53, %v415_v53  ;;  %v3038_v53 = vld [vmem:[%s2736_s28 + $0x160] sm:$0x3]  ;;  %4526 = vst [vmem:[#allocation31_spill] sm:$0xff] %v3058_v41 }
  0x5a   : > { %v418_v21 = vsel %vm350_vm0, %v416_v48, %v417_v15  ;;  %v424_v48 = vrot.slane %v3038_v53, 1 }
  0x5b   : > { %4522 = vst [vmem:[#allocation27_spill] sm:$0xff] %v3024_v30  ;;  %573 = vrot.lane.b32.xlu2 %v3018_v27, %s2652_s29  ;;  %v3050_v44 = vpack.c.bf16 %v418_v21, %v418_v21  ;;  %v3053_v27 = vld [vmem:[%s2736_s28 + $0x168] sm:$0xff] }
  0x5c   : > { %v426_v15 = vrot.slane %v3053_v27, 1  ;;  %v425_v21 = vsel %vm350_vm0, %v422_v47, %v424_v48  ;;  %v662_v47 = vrot.slane %v2739_v0, 2  ;;  %v663_v48 = vrot.slane %v2742_v1, 2 }
  0x5d   : > { %4524 = vst [vmem:[#allocation29_spill] sm:$0xff] %v3050_v44 }
  0x60   : > { %577 = vrot.lane.b32.xlu1 %v3024_v30, %s2652_s29  ;;  %v3056_v30 = vpack.c.bf16 %v423_v58, %v423_v58  ;;  %v3072_v58 = vpack.c.bf16 %v425_v21, %v425_v21 }
  0x61   : > { %575 = vrot.lane.b32.xlu0 %v3026_v34, %s2652_s29  ;;  %v427_v34 = vrot.slane %v3045_v56, 1 }
  0x62   : > { %4525 = vst [vmem:[#allocation30_spill] sm:$0xff] %v3056_v30 }
  0x63   : > { %579 = vrot.lane.b32.xlu2 %v3050_v44, %s2652_s29  ;;  %v430_v59 = vsel %vm350_vm0, %v427_v34, %v429_v31  ;;  %v428_v50 = vsel %vm350_vm0, %v426_v15, %v427_v34  ;;  %v660_v44 = vrot.slane %v2758_v9, 2  ;;  %v664_v31 = vsel %vm656_vm1, %v662_v47, %v663_v48 }
  0x64   : > { %v3075_v29 = vpack.c.bf16 %v430_v59, %v430_v59  ;;  %v3077_v13 = vpack.c.bf16 %v428_v50, %v428_v50  ;;  %v3093_v15 = vpack.c.bf16 %v2763_v12, %v2763_v12  ;;  %v237_v9 = vpack.c.bf16 %v2745_v2, %v2745_v2 }
  0x65   : > { %v665_v50 = vrot.slane %v2754_v7, 2  ;;  %v3105_v47 = vpack.c.bf16 %v664_v31, %v664_v31  ;;  %v668_v2 = vrot.slane %v2770_v16, 2 }
  0x66   : > { %4527 = vst [vmem:[#allocation32_spill] sm:$0xff] %v3075_v29 }
  0x67   : > { %4528 = vst [vmem:[#allocation33_spill] sm:$0xff] %v3077_v13  ;;  %v666_v7 = vsel %vm656_vm1, %v663_v48, %v665_v50 }
  0x68   : > { %583 = vrot.lane.b32.xlu1 %v3056_v30, %s2652_s29  ;;  %v658_v30 = vrot.slane %v2750_v5, 2  ;;  %274 = vst.msk [vmem:[#allocation2 + $0x10] sm:$0xf] %vm269_vm2, %v3093_v15  ;;  %v3130_v31 = vpack.c.bf16 %v666_v7, %v666_v7  ;;  %v3165_v7 = vpack.c.bf16 %v2789_v25, %v2789_v25 }
  0x69   : > { %581 = vrot.lane.b32.xlu0 %v3058_v41, %s2652_s29  ;;  %270 = vst.msk [vmem:[#allocation2] sm:$0xf] %vm269_vm2, %v237_v9  ;;  %v672_v9 = vrot.slane %v2789_v25, 2 }
  0x6a   : > { %v659_v34 = vsel %vm656_vm1, %v657_v45, %v658_v30  ;;  %v661_v21 = vsel %vm656_vm1, %v658_v30, %v660_v44  ;;  %v3100_v45 = vpack.c.bf16 %v2739_v0, %v2739_v0  ;;  %v670_v44 = vrot.slane %v2776_v19, 2  ;;  %276 = vst.msk [vmem:[#allocation2 + $0x18] sm:$0xf] %vm269_vm2, %v3165_v7 }
  0x6b   : > { %585 = vrot.lane.b32.xlu2 %v3072_v58, %s2652_s29  ;;  %v769_v59 = vpack.c.bf16 %v659_v34, %v659_v34  ;;  %v667_v0 = vrot.slane %v2763_v12, 2  ;;  %v3121_v34 = vpack.c.bf16 %v2770_v16, %v2770_v16  ;;  %v3125_v19 = vpack.c.bf16 %v2742_v1, %v2742_v1 }
  0x6c   : > { %272 = vst.msk [vmem:[#allocation2 + $0x8] sm:$0xf] %vm269_vm2, %v3100_v45  ;;  %v671_v30 = vsel %vm656_vm1, %v668_v2, %v670_v44  ;;  %v238_v12 = vpack.c.bf16 %v2750_v5, %v2750_v5  ;;  %v677_v16 = vrot.slane %v2806_v35, 2  ;;  %v673_v5 = vrot.slane %v2783_v23, 2 }
  0x6d   : > { %v669_v48 = vsel %vm656_vm1, %v667_v0, %v668_v2  ;;  %275 = vst.msk [vmem:[#allocation2 + $0x14] sm:$0xf] %vm269_vm2, %v3121_v34  ;;  %v3161_v0 = vpack.c.bf16 %v2783_v23, %v2783_v23  ;;  %v685_v23 = vrot.slane %v2840_v51, 2 }
  0x6e   : > { %273 = vst.msk [vmem:[#allocation2 + $0xc] sm:$0xf] %vm269_vm2, %v3125_v19  ;;  %v3141_v1 = vpack.c.bf16 %v669_v48, %v669_v48  ;;  %v674_v50 = vsel %vm656_vm1, %v672_v9, %v673_v5  ;;  %v680_v48 = vrot.slane %v2823_v42, 2 }
  0x6f   : > { %271 = vst.msk [vmem:[#allocation2 + $0x4] sm:$0xf] %vm269_vm2, %v238_v12  ;;  %v3168_v12 = vpack.c.bf16 %v674_v50, %v674_v50  ;;  %v3199_v50 = vpack.c.bf16 %v2812_v38, %v2812_v38 }
  0x70   : > { %589 = vrot.lane.b32.xlu1 %v3075_v29, %s2652_s29  ;;  %v770_v29 = vpack.c.bf16 %v661_v21, %v661_v21  ;;  %v678_v21 = vrot.slane %v2818_v40, 2  ;;  %277 = vst.msk [vmem:[#allocation2 + $0x1c] sm:$0xf] %vm269_vm2, %v3161_v0 }
  0x71   : > { %587 = vrot.lane.b32.xlu0 %v3077_v13, %s2652_s29  ;;  %280 = vst.msk [vmem:[#allocation2 + $0x28] sm:$0xf] %vm269_vm2, %v3199_v50  ;;  %s4120_s29 = scalar_lea.vmem %s4405_s2, %s2512_s26 }
  0x72   : > { %v679_v2 = vsel %vm656_vm1, %v677_v16, %v678_v21  ;;  %v682_v16 = vrot.slane %v2812_v38, 2  ;;  %v681_v42 = vsel %vm656_vm1, %v678_v21, %v680_v48  ;;  %v3203_v21 = vpack.c.bf16 %v2818_v40, %v2818_v40 }
  0x73   : > { %833 = vrot.lane.b32.xlu2 %v769_v59, %s2653_s30  ;;  %v675_v59 = vrot.slane %v2786_v24, 2  ;;  %v3157_v24 = vpack.c.bf16 %v2806_v35, %v2806_v35  ;;  %v3173_v9 = vpack.c.bf16 %v679_v2, %v679_v2  ;;  %v683_v35 = vrot.slane %v2815_v39, 2 }
  0x74   : > { %v693_v40 = vrot.slane %v2884_v14, 2  ;;  %279 = vst.msk [vmem:[#allocation2 + $0x24] sm:$0xf] %vm269_vm2, %v3203_v21 }
  0x75   : > { %278 = vst.msk [vmem:[#allocation2 + $0x20] sm:$0xf] %vm269_vm2, %v3157_v24  ;;  %v686_v51 = vsel %vm656_vm1, %v683_v35, %v685_v23  ;;  %v684_v2 = vsel %vm656_vm1, %v682_v16, %v683_v35  ;;  %v688_v35 = vrot.slane %v2847_v54, 2  ;;  %v690_v23 = vrot.slane %v2850_v55, 2 }
  0x76   : > { %v3211_v48 = vpack.c.bf16 %v686_v51, %v686_v51  ;;  %v3215_v38 = vpack.c.bf16 %v684_v2, %v684_v2 }
  0x77   : > { %v691_v2 = vsel %vm656_vm1, %v688_v35, %v690_v23  ;;  %v698_v23 = vrot.slane %v2881_v11, 2 }
  0x78   : > { %837 = vrot.lane.b32.xlu1 %v3105_v47, %s2653_s30  ;;  %4531 = vst [vmem:[#allocation36_spill] sm:$0xff] %v3211_v48 }
  0x79   : > { %835 = vrot.lane.b32.xlu0 %v770_v29, %s2653_s30  ;;  %v3135_v29 = vpack.c.bf16 %v671_v30, %v671_v30  ;;  %v676_v30 = vsel %vm656_vm1, %v673_v5, %v675_v59  ;;  %v3195_v59 = vpack.c.bf16 %v2815_v39, %v2815_v39  ;;  %v692_v39 = vrot.slane %v2871_v4, 2 }
  0x7a   : > { %v3179_v25 = vpack.c.bf16 %v676_v30, %v676_v30  ;;  %v687_v30 = vrot.slane %v2855_v57, 2 }
  0x7b   : > { %839 = vrot.lane.b32.xlu2 %v3130_v31, %s2653_s30  ;;  %4529 = vst [vmem:[#allocation34_spill] sm:$0xff] %v3195_v59  ;;  %v694_v51 = vsel %vm656_vm1, %v692_v39, %v693_v40  ;;  %v695_v39 = vrot.slane %v2889_v17, 2 }
  0x7c   : > { %281 = vst.msk [vmem:[#allocation2 + $0x2c] sm:$0xf] %vm269_vm2, %v3195_v59  ;;  %v689_v16 = vsel %vm656_vm1, %v687_v30, %v688_v35  ;;  %v3241_v30 = vpack.c.bf16 %v2847_v54, %v2847_v54  ;;  %v3252_v35 = vpack.c.bf16 %v691_v2, %v691_v2  ;;  %v700_v54 = vrot.slane %v2906_v32, 2 }
  0x7d   : > { %v536_v44 = vpop.permute.xlu2 %535  ;;  %v3281_v2 = vpack.c.bf16 %v2878_v10, %v2878_v10 }
  0x7e   : > { %628 = vst.msk [vmem:[#allocation2 + $0x10] sm:$0xf] %vm623_vm3, %v536_v44  ;;  %v3206_v44 = vpack.c.bf16 %v681_v42, %v681_v42  ;;  %v701_v32 = vsel %vm656_vm1, %v698_v23, %v700_v54  ;;  %v702_v54 = vrot.slane %v2921_v46, 2 }
  0x7f   : > { %283 = vst.msk [vmem:[#allocation2 + $0x34] sm:$0xf] %vm269_vm2, %v3241_v30 }
  0x80   : > { %843 = vrot.lane.b32.xlu1 %v3135_v29, %s2653_s30  ;;  %4530 = vst [vmem:[#allocation35_spill] sm:$0xff] %v3206_v44 }
  0x81   : > { %841 = vrot.lane.b32.xlu0 %v3141_v1, %s2653_s30  ;;  %4534 = vst [vmem:[#allocation39_spill] sm:$0xff] %v3281_v2 }
  0x82   : > { %286 = vst.msk [vmem:[#allocation2 + $0x40] sm:$0xf] %vm269_vm2, %v3281_v2 }
  0x83   : > { %845 = vrot.lane.b32.xlu2 %v3168_v12, %s2653_s30 }
  0x85   : > { %v538_v5 = vpop.permute.xlu2 %537 }
  0x86   : > { %629 = vst.msk [vmem:[#allocation2 + $0x14] sm:$0xf] %vm623_vm3, %v538_v5  ;;  %v3234_v5 = vpack.c.bf16 %v2871_v4, %v2871_v4  ;;  %v3250_v4 = vpack.c.bf16 %v694_v51, %v694_v51 }
  0x88   : > { %849 = vrot.lane.b32.xlu1 %v3173_v9, %s2653_s30  ;;  %284 = vst.msk [vmem:[#allocation2 + $0x38] sm:$0xf] %vm269_vm2, %v3234_v5 }
  0x89   : > { %847 = vrot.lane.b32.xlu0 %v3179_v25, %s2653_s30 }
  0x8b   : > { %851 = vrot.lane.b32.xlu2 %v3206_v44, %s2653_s30  ;;  %v3237_v44 = vpack.c.bf16 %v689_v16, %v689_v16  ;;  %v697_v16 = vrot.slane %v2878_v10, 2  ;;  %v708_v10 = vrot.slane %v2950_v8, 2 }
  0x8d   : > { %v544_v42 = vpop.permute.xlu2 %543 }
  0x8e   : > { %632 = vst.msk [vmem:[#allocation2 + $0x20] sm:$0xf] %vm623_vm3, %v544_v42  ;;  %v3247_v42 = vpack.c.bf16 %v2855_v57, %v2855_v57  ;;  %v696_v57 = vsel %vm656_vm1, %v693_v40, %v695_v39  ;;  %v699_v40 = vsel %vm656_vm1, %v697_v16, %v698_v23  ;;  %v707_v16 = vrot.slane %v2937_v61, 2 }
  0x8f   : > { %v3292_v23 = vpack.c.bf16 %v699_v40, %v699_v40  ;;  %v3315_v40 = vpack.c.bf16 %v2937_v61, %v2937_v61 }
  0x90   : > { %855 = vrot.lane.b32.xlu1 %v3211_v48, %s2653_s30  ;;  %282 = vst.msk [vmem:[#allocation2 + $0x30] sm:$0xf] %vm269_vm2, %v3247_v42 }
  0x91   : > { %853 = vrot.lane.b32.xlu0 %v3215_v38, %s2653_s30  ;;  %4536 = vst [vmem:[#allocation41_spill] sm:$0xff] %v3292_v23 }
  0x92   : > { %v532_v55 = vpop.permute.xlu1 %531  ;;  %290 = vst.msk [vmem:[#allocation2 + $0x50] sm:$0xf] %vm269_vm2, %v3315_v40 }
  0x93   : > { %626 = vst.msk [vmem:[#allocation2 + $0x8] sm:$0xf] %vm623_vm3, %v532_v55  ;;  %v528_v48 = vpop.permute.xlu0 %527  ;;  %857 = vrot.lane.b32.xlu2 %v3237_v44, %s2653_s30  ;;  %v3277_v55 = vpack.c.bf16 %v696_v57, %v696_v57  ;;  %v703_v57 = vrot.slane %v2913_v36, 2 }
  0x94   : > { %624 = vst.msk [vmem:[#allocation2] sm:$0xf] %vm623_vm3, %v528_v48  ;;  %v3274_v48 = vpack.c.bf16 %v2881_v11, %v2881_v11  ;;  %v3290_v11 = vpack.c.bf16 %v701_v32, %v701_v32 }
  0x95   : > { %v550_v17 = vpop.permute.xlu2 %549  ;;  %4533 = vst [vmem:[#allocation38_spill] sm:$0xff] %v3277_v55 }
  0x96   : > { %635 = vst.msk [vmem:[#allocation2 + $0x2c] sm:$0xf] %vm623_vm3, %v550_v17  ;;  %v3287_v17 = vpack.c.bf16 %v2884_v14, %v2884_v14  ;;  %v704_v14 = vsel %vm656_vm1, %v702_v54, %v703_v57 }
  0x97   : > { %4532 = vst [vmem:[#allocation37_spill] sm:$0xff] %v3274_v48 }
  0x98   : > { %861 = vrot.lane.b32.xlu1 %v3250_v4, %s2653_s30  ;;  %4535 = vst [vmem:[#allocation40_spill] sm:$0xff] %v3290_v11 }
  0x99   : > { %859 = vrot.lane.b32.xlu0 %v3252_v35, %s2653_s30  ;;  %287 = vst.msk [vmem:[#allocation2 + $0x44] sm:$0xf] %vm269_vm2, %v3274_v48 }
  0x9a   : > { %v534_v51 = vpop.permute.xlu1 %533  ;;  %285 = vst.msk [vmem:[#allocation2 + $0x3c] sm:$0xf] %vm269_vm2, %v3287_v17 }
  0x9b   : > { %627 = vst.msk [vmem:[#allocation2 + $0xc] sm:$0xf] %vm623_vm3, %v534_v51  ;;  %v530_v39 = vpop.permute.xlu0 %529  ;;  %v705_v51 = vrot.slane %v2916_v37, 2  ;;  %863 = vrot.lane.b32.xlu2 %v3277_v55, %s2653_s30  ;;  %v709_v37 = vsel %vm656_vm1, %v707_v16, %v708_v10  ;;  %v3318_v55 = vpack.c.bf16 %v704_v14, %v704_v14  ;;  %v710_v16 = vrot.slane %v2955_v22, 2 }
  0x9c   : > { %625 = vst.msk [vmem:[#allocation2 + $0x4] sm:$0xf] %vm623_vm3, %v530_v39  ;;  %v3331_v61 = vpack.c.bf16 %v709_v37, %v709_v37  ;;  %v712_v14 = vrot.slane %v2944_v3, 2 }
  0x9d   : > { %v556_v32 = vpop.permute.xlu2 %555  ;;  %v706_v54 = vsel %vm656_vm1, %v703_v57, %v705_v51  ;;  %v713_v51 = vrot.slane %v2947_v6, 2 }
  0x9e   : > { %638 = vst.msk [vmem:[#allocation2 + $0x38] sm:$0xf] %vm623_vm3, %v556_v32  ;;  %v3328_v32 = vpack.c.bf16 %v2921_v46, %v2921_v46  ;;  %v3333_v57 = vpack.c.bf16 %v706_v54, %v706_v54  ;;  %v711_v46 = vsel %vm656_vm1, %v708_v10, %v710_v16  ;;  %v3362_v54 = vpack.c.bf16 %v2944_v3, %v2944_v3 }
  0x9f   : > { %v714_v10 = vsel %vm656_vm1, %v712_v14, %v713_v51  ;;  %v722_v14 = vrot.slane %v3003_v43, 2  ;;  %v723_v3 = vrot.slane %v3016_v18, 2 }
  0xa0   : > { %867 = vrot.lane.b32.xlu1 %v3290_v11, %s2653_s30  ;;  %v3322_v11 = vpack.c.bf16 %v2913_v36, %v2913_v36  ;;  %4538 = vst [vmem:[#allocation43_spill] sm:$0xff] %v3328_v32  ;;  %v715_v36 = vrot.slane %v2972_v52, 2 }
  0xa1   : > { %865 = vrot.lane.b32.xlu0 %v3292_v23, %s2653_s30  ;;  %4539 = vst [vmem:[#allocation44_spill] sm:$0xff] %v3333_v57 }
  0xa2   : > { %v542_v39 = vpop.permute.xlu1 %541  ;;  %4537 = vst [vmem:[#allocation42_spill] sm:$0xff] %v3322_v11  ;;  %v716_v52 = vsel %vm656_vm1, %v713_v51, %v715_v36  ;;  %v717_v36 = vrot.slane %v2987_v26, 2  ;;  %v3373_v51 = vpack.c.bf16 %v714_v10, %v714_v10  ;;  %v3396_v10 = vpack.c.bf16 %v3003_v43, %v3003_v43 }
  0xa3   : > { %631 = vst.msk [vmem:[#allocation2 + $0x1c] sm:$0xf] %vm623_vm3, %v542_v39  ;;  %v540_v23 = vpop.permute.xlu0 %539  ;;  %869 = vrot.lane.b32.xlu2 %v3318_v55, %s2653_s30  ;;  %v3358_v39 = vpack.c.bf16 %v711_v46, %v711_v46  ;;  %v718_v46 = vrot.slane %v2979_v62, 2 }
  0xa4   : > { %630 = vst.msk [vmem:[#allocation2 + $0x18] sm:$0xf] %vm623_vm3, %v540_v23  ;;  %v3355_v23 = vpack.c.bf16 %v2947_v6, %v2947_v6  ;;  %v3371_v6 = vpack.c.bf16 %v716_v52, %v716_v52 }
  0xa5   : > { %289 = vst.msk [vmem:[#allocation2 + $0x4c] sm:$0xf] %vm269_vm2, %v3322_v11  ;;  %v562_v22 = vpop.permute.xlu2 %561 }
  0xa6   : > { %288 = vst.msk [vmem:[#allocation2 + $0x48] sm:$0xf] %vm269_vm2, %v3328_v32 }
  0xa7   : > { %641 = vst.msk [vmem:[#allocation2 + $0x44] sm:$0xf] %vm623_vm3, %v562_v22  ;;  %v3368_v22 = vpack.c.bf16 %v2950_v8, %v2950_v8  ;;  %v719_v8 = vsel %vm656_vm1, %v717_v36, %v718_v46 }
  0xa8   : > { %873 = vrot.lane.b32.xlu1 %v3331_v61, %s2653_s30  ;;  %4540 = vst [vmem:[#allocation45_spill] sm:$0xff] %v3358_v39 }
  0xa9   : > { %871 = vrot.lane.b32.xlu0 %v3333_v57, %s2653_s30  ;;  %4541 = vst [vmem:[#allocation46_spill] sm:$0xff] %v3371_v6 }
  0xaa   : > { %v548_v37 = vpop.permute.xlu1 %547  ;;  %4542 = vst [vmem:[#allocation47_spill] sm:$0xff] %v3373_v51 }
  0xab   : > { %634 = vst.msk [vmem:[#allocation2 + $0x28] sm:$0xf] %vm623_vm3, %v548_v37  ;;  %v546_v16 = vpop.permute.xlu0 %545  ;;  %v720_v37 = vrot.slane %v2982_v63, 2  ;;  %875 = vrot.lane.b32.xlu2 %v3358_v39, %s2653_s30  ;;  %v724_v63 = vsel %vm656_vm1, %v722_v14, %v723_v3  ;;  %v3399_v39 = vpack.c.bf16 %v719_v8, %v719_v8  ;;  %v725_v14 = vrot.slane %v3021_v33, 2 }
  0xac   : > { %633 = vst.msk [vmem:[#allocation2 + $0x24] sm:$0xf] %vm623_vm3, %v546_v16  ;;  %v3412_v43 = vpack.c.bf16 %v724_v63, %v724_v63  ;;  %v727_v8 = vrot.slane %v3010_v49, 2 }
  0xad   : > { %293 = vst.msk [vmem:[#allocation2 + $0x5c] sm:$0xf] %vm269_vm2, %v3355_v23  ;;  %v568_v52 = vpop.permute.xlu2 %567  ;;  %v721_v36 = vsel %vm656_vm1, %v718_v46, %v720_v37  ;;  %v728_v37 = vrot.slane %v3013_v20, 2 }
  0xae   : > { %292 = vst.msk [vmem:[#allocation2 + $0x58] sm:$0xf] %vm269_vm2, %v3362_v54  ;;  %v3414_v46 = vpack.c.bf16 %v721_v36, %v721_v36  ;;  %v3443_v36 = vpack.c.bf16 %v3010_v49, %v3010_v49  ;;  %v735_v49 = vrot.slane %v3048_v60, 2  ;;  %v3474_v60 = vpack.c.bf16 %v3045_v56, %v3045_v56 }
  0xaf   : > { %291 = vst.msk [vmem:[#allocation2 + $0x54] sm:$0xf] %vm269_vm2, %v3368_v22 }
  0xb0   : > { %879 = vrot.lane.b32.xlu1 %v3371_v6, %s2653_s30  ;;  %644 = vst.msk [vmem:[#allocation2 + $0x50] sm:$0xf] %vm623_vm3, %v568_v52  ;;  %v3403_v6 = vpack.c.bf16 %v2979_v62, %v2979_v62  ;;  %v3409_v52 = vpack.c.bf16 %v2987_v26, %v2987_v26  ;;  %v730_v62 = vrot.slane %v3038_v53, 2  ;;  %v726_v26 = vsel %vm656_vm1, %v723_v3, %v725_v14 }
  0xb1   : > { %877 = vrot.lane.b32.xlu0 %v3373_v51, %s2653_s30  ;;  %4543 = vst [vmem:[#allocation48_spill] sm:$0xff] %v3396_v10  ;;  %v729_v3 = vsel %vm656_vm1, %v727_v8, %v728_v37  ;;  %v733_v8 = vrot.slane %v3045_v56, 2 }
  0xb2   : > { %v554_v16 = vpop.permute.xlu1 %553  ;;  %4544 = vst [vmem:[#allocation49_spill] sm:$0xff] %v3403_v6  ;;  %v731_v53 = vsel %vm656_vm1, %v728_v37, %v730_v62  ;;  %v732_v62 = vrot.slane %v3053_v27, 2  ;;  %v3454_v37 = vpack.c.bf16 %v729_v3, %v729_v3 }
  0xb3   : > { %637 = vst.msk [vmem:[#allocation2 + $0x34] sm:$0xf] %vm623_vm3, %v554_v16  ;;  %v552_v51 = vpop.permute.xlu0 %551  ;;  %881 = vrot.lane.b32.xlu2 %v3399_v39, %s2653_s30  ;;  %v3439_v16 = vpack.c.bf16 %v726_v26, %v726_v26 }
  0xb4   : > { %4545 = vst [vmem:[#allocation50_spill] sm:$0xff] %v3409_v52 }
  0xb5   : > { %636 = vst.msk [vmem:[#allocation2 + $0x30] sm:$0xf] %vm623_vm3, %v552_v51  ;;  %v574_v33 = vpop.permute.xlu2 %573  ;;  %v3436_v51 = vpack.c.bf16 %v3013_v20, %v3013_v20  ;;  %v3452_v20 = vpack.c.bf16 %v731_v53, %v731_v53 }
  0xb6   : > { %296 = vst.msk [vmem:[#allocation2 + $0x68] sm:$0xf] %vm269_vm2, %v3396_v10 }
  0xb7   : > { %295 = vst.msk [vmem:[#allocation2 + $0x64] sm:$0xf] %vm269_vm2, %v3403_v6 }
  0xb8   : > { %294 = vst.msk [vmem:[#allocation2 + $0x60] sm:$0xf] %vm269_vm2, %v3409_v52  ;;  %885 = vrot.lane.b32.xlu1 %v3412_v43, %s2653_s30 }
  0xb9   : > { %883 = vrot.lane.b32.xlu0 %v3414_v46, %s2653_s30  ;;  %647 = vst.msk [vmem:[#allocation2 + $0x5c] sm:$0xf] %vm623_vm3, %v574_v33  ;;  %v3449_v33 = vpack.c.bf16 %v3016_v18, %v3016_v18  ;;  %v734_v18 = vsel %vm656_vm1, %v732_v62, %v733_v8 }
  0xba   : > { %v560_v63 = vpop.permute.xlu1 %559  ;;  %4547 = vst [vmem:[#allocation52_spill] sm:$0xff] %v3452_v20  ;;  %v3477_v3 = vpack.c.bf16 %v734_v18, %v734_v18 }
  0xbb   : > { %640 = vst.msk [vmem:[#allocation2 + $0x40] sm:$0xf] %vm623_vm3, %v560_v63  ;;  %v558_v14 = vpop.permute.xlu0 %557  ;;  %887 = vrot.lane.b32.xlu2 %v3439_v16, %s2653_s30  ;;  %v736_v63 = vsel %vm656_vm1, %v733_v8, %v735_v49 }
  0xbc   : > { %4546 = vst [vmem:[#allocation51_spill] sm:$0xff] %v3449_v33 }
  0xbd   : > { %639 = vst.msk [vmem:[#allocation2 + $0x3c] sm:$0xf] %vm623_vm3, %v558_v14  ;;  %v580_v26 = vpop.permute.xlu2 %579  ;;  %v3481_v14 = vpack.c.bf16 %v3053_v27, %v3053_v27 }
  0xbe   : > { %299 = vst.msk [vmem:[#allocation2 + $0x74] sm:$0xf] %vm269_vm2, %v3436_v51 }
  0xbf   : > { %298 = vst.msk [vmem:[#allocation2 + $0x70] sm:$0xf] %vm269_vm2, %v3443_v36 }
  0xc0   : > { %297 = vst.msk [vmem:[#allocation2 + $0x6c] sm:$0xf] %vm269_vm2, %v3449_v33  ;;  %891 = vrot.lane.b32.xlu1 %v3452_v20, %s2653_s30  ;;  %v3485_v20 = vpack.c.bf16 %v736_v63, %v736_v63 }
  0xc1   : > { %889 = vrot.lane.b32.xlu0 %v3454_v37, %s2653_s30  ;;  %650 = vst.msk [vmem:[#allocation2 + $0x68] sm:$0xf] %vm623_vm3, %v580_v26 }
  0xc2   : > { %4548 = vst [vmem:[#allocation53_spill] sm:$0xff] %v3474_v60  ;;  %v566_v53 = vpop.permute.xlu1 %565 }
  0xc3   : > { %4549 = vst [vmem:[#allocation54_spill] sm:$0xff] %v3481_v14  ;;  %v564_v62 = vpop.permute.xlu0 %563  ;;  %893 = vrot.lane.b32.xlu2 %v3477_v3, %s2653_s30 }
  0xc4   : > { %643 = vst.msk [vmem:[#allocation2 + $0x4c] sm:$0xf] %vm623_vm3, %v566_v53 }
  0xc5   : > { %642 = vst.msk [vmem:[#allocation2 + $0x48] sm:$0xf] %vm623_vm3, %v564_v62  ;;  %v586_v56 = vpop.permute.xlu2 %585 }
  0xc6   : > { %4550 = vst [vmem:[#allocation55_spill] sm:$0xff] %v3485_v20 }
  0xc7   : > { %301 = vst.msk [vmem:[#allocation2 + $0x7c] sm:$0xf] %vm269_vm2, %v3474_v60 }
  0xc8   : > { %300 = vst.msk [vmem:[#allocation2 + $0x78] sm:$0xf] %vm269_vm2, %v3481_v14  ;;  %996 = vrot.lane.b32.xlu1 %v3100_v45, %s2654_s4 }
  0xc9   : > { %895 = vrot.lane.b32.xlu0 %v3485_v20, %s2653_s30  ;;  %653 = vst.msk [vmem:[#allocation2 + $0x74] sm:$0xf] %vm623_vm3, %v586_v56  ;;  %s2416_s30 = sshll.u32 %s169_s24, 1 }
  0xca   : > { %v572_v27 = vpop.permute.xlu1 %571 }
  0xcb   : > { %646 = vst.msk [vmem:[#allocation2 + $0x58] sm:$0xf] %vm623_vm3, %v572_v27  ;;  %v570_v8 = vpop.permute.xlu0 %569  ;;  %998 = vrot.lane.b32.xlu2 %v3125_v19, %s2654_s4 }
  0xcc   : > { %645 = vst.msk [vmem:[#allocation2 + $0x54] sm:$0xf] %vm623_vm3, %v570_v8 }
  0xcd   : > { %v834_v45 = vpop.permute.xlu2 %833 }
  0xce   : > { %930 = vst.msk [vmem:[#allocation2] sm:$0xf] %vm929_vm4, %v834_v45 }
  0xd0   : > { %1002 = vrot.lane.b32.xlu1 %v3121_v34, %s2654_s4 }
  0xd1   : > { %1000 = vrot.lane.b32.xlu0 %v3093_v15, %s2654_s4 }
  0xd2   : > { %v578_v49 = vpop.permute.xlu1 %577 }
  0xd3   : > { %649 = vst.msk [vmem:[#allocation2 + $0x64] sm:$0xf] %vm623_vm3, %v578_v49  ;;  %v576_v18 = vpop.permute.xlu0 %575  ;;  %1004 = vrot.lane.b32.xlu2 %v3165_v7, %s2654_s4 }
  0xd4   : > { %648 = vst.msk [vmem:[#allocation2 + $0x60] sm:$0xf] %vm623_vm3, %v576_v18 }
  0xd5   : > { %v840_v19 = vpop.permute.xlu2 %839 }
  0xd6   : > { %933 = vst.msk [vmem:[#allocation2 + $0xc] sm:$0xf] %vm929_vm4, %v840_v19 }
  0xd8   : > { %1008 = vrot.lane.b32.xlu1 %v3157_v24, %s2654_s4 }
  0xd9   : > { %1006 = vrot.lane.b32.xlu0 %v3161_v0, %s2654_s4 }
  0xda   : > { %v584_v26 = vpop.permute.xlu1 %583 }
  0xdb   : > { %652 = vst.msk [vmem:[#allocation2 + $0x70] sm:$0xf] %vm623_vm3, %v584_v26  ;;  %v582_v53 = vpop.permute.xlu0 %581  ;;  %1010 = vrot.lane.b32.xlu2 %v3203_v21, %s2654_s4 }
  0xdc   : > { %651 = vst.msk [vmem:[#allocation2 + $0x6c] sm:$0xf] %vm623_vm3, %v582_v53 }
  0xdd   : > { %v846_v63 = vpop.permute.xlu2 %845 }
  0xde   : > { %936 = vst.msk [vmem:[#allocation2 + $0x18] sm:$0xf] %vm929_vm4, %v846_v63 }
  0xe0   : > { %1014 = vrot.lane.b32.xlu1 %v3195_v59, %s2654_s4 }
  0xe1   : > { %1012 = vrot.lane.b32.xlu0 %v3199_v50, %s2654_s4 }
  0xe2   : > { %v590_v62 = vpop.permute.xlu1 %589 }
  0xe3   : > { %655 = vst.msk [vmem:[#allocation2 + $0x7c] sm:$0xf] %vm623_vm3, %v590_v62  ;;  %v588_v56 = vpop.permute.xlu0 %587  ;;  %1016 = vrot.lane.b32.xlu2 %v3247_v42, %s2654_s4 }
  0xe4   : > { %654 = vst.msk [vmem:[#allocation2 + $0x78] sm:$0xf] %vm623_vm3, %v588_v56 }
  0xe5   : > { %v852_v27 = vpop.permute.xlu2 %851 }
  0xe6   : > { %939 = vst.msk [vmem:[#allocation2 + $0x24] sm:$0xf] %vm929_vm4, %v852_v27 }
  0xe8   : > { %1020 = vrot.lane.b32.xlu1 %v3234_v5, %s2654_s4 }
  0xe9   : > { %1018 = vrot.lane.b32.xlu0 %v3241_v30, %s2654_s4 }
  0xea   : > { %v838_v8 = vpop.permute.xlu1 %837 }
  0xeb   : > { %932 = vst.msk [vmem:[#allocation2 + $0x8] sm:$0xf] %vm929_vm4, %v838_v8  ;;  %v836_v45 = vpop.permute.xlu0 %835  ;;  %1022 = vrot.lane.b32.xlu2 %v3287_v17, %s2654_s4 }
  0xec   : > { %931 = vst.msk [vmem:[#allocation2 + $0x4] sm:$0xf] %vm929_vm4, %v836_v45 }
  0xed   : > { %v858_v49 = vpop.permute.xlu2 %857 }
  0xee   : > { %942 = vst.msk [vmem:[#allocation2 + $0x30] sm:$0xf] %vm929_vm4, %v858_v49 }
  0xf0   : > { %1026 = vrot.lane.b32.xlu1 %v3274_v48, %s2654_s4 }
  0xf1   : > { %1024 = vrot.lane.b32.xlu0 %v3281_v2, %s2654_s4 }
  0xf2   : > { %v844_v18 = vpop.permute.xlu1 %843 }
  0xf3   : > { %935 = vst.msk [vmem:[#allocation2 + $0x14] sm:$0xf] %vm929_vm4, %v844_v18  ;;  %v842_v19 = vpop.permute.xlu0 %841  ;;  %1028 = vrot.lane.b32.xlu2 %v3328_v32, %s2654_s4 }
  0xf4   : > { %934 = vst.msk [vmem:[#allocation2 + $0x10] sm:$0xf] %vm929_vm4, %v842_v19  ;;  %v3579_v19 = vld [vmem:[%s2736_s28 + $0x180] sm:$0xff] }
  0xf5   : > { %v864_v26 = vpop.permute.xlu2 %863  ;;  %4551 = vst [vmem:[#allocation56_spill] sm:$0xff] %v3579_v19 }
  0xf6   : > { %945 = vst.msk [vmem:[#allocation2 + $0x3c] sm:$0xf] %vm929_vm4, %v864_v26 }
  0xf8   : > { %1032 = vrot.lane.b32.xlu1 %v3315_v40, %s2654_s4 }
  0xf9   : > { %1030 = vrot.lane.b32.xlu0 %v3322_v11, %s2654_s4  ;;  %v4564_v11 = vld [vmem:[#allocation14_spill] sm:$0xff] }
  0xfa   : > { %v850_v53 = vpop.permute.xlu1 %849 }
  0xfb   : > { %938 = vst.msk [vmem:[#allocation2 + $0x20] sm:$0xf] %vm929_vm4, %v850_v53  ;;  %v848_v63 = vpop.permute.xlu0 %847  ;;  %1034 = vrot.lane.b32.xlu2 %v3368_v22, %s2654_s4 }
  0xfc   : > { %937 = vst.msk [vmem:[#allocation2 + $0x1c] sm:$0xf] %vm929_vm4, %v848_v63  ;;  %v3586_v63 = vpack.c.bf16 %v3579_v19, %v3579_v19 }
  0xfd   : > { %v870_v62 = vpop.permute.xlu2 %869 }
  0xfe   : > { %948 = vst.msk [vmem:[#allocation2 + $0x48] sm:$0xf] %vm929_vm4, %v870_v62  ;;  %v3591_v62 = vld [vmem:[%s2736_s28 + $0x188] sm:$0xff] }
  0xff   : > { %4552 = vst [vmem:[#allocation57_spill] sm:$0xff] %v3586_v63 }
 0x100   : > { %1038 = vrot.lane.b32.xlu1 %v3355_v23, %s2654_s4  ;;  %4553 = vst [vmem:[#allocation58_spill] sm:$0xff] %v3591_v62 }
 0x101   : > { %1036 = vrot.lane.b32.xlu0 %v3362_v54, %s2654_s4 }
 0x102   : > { %v856_v56 = vpop.permute.xlu1 %855 }
 0x103   : > { %941 = vst.msk [vmem:[#allocation2 + $0x2c] sm:$0xf] %vm929_vm4, %v856_v56  ;;  %v854_v27 = vpop.permute.xlu0 %853  ;;  %1040 = vrot.lane.b32.xlu2 %v3409_v52, %s2654_s4  ;;  %v4570_v52 = vld [vmem:[#allocation20_spill] sm:$0xff] }
 0x104   : > { %940 = vst.msk [vmem:[#allocation2 + $0x28] sm:$0xf] %vm929_vm4, %v854_v27 }
 0x105   : > { %v876_v8 = vpop.permute.xlu2 %875 }
 0x106   : > { %951 = vst.msk [vmem:[#allocation2 + $0x54] sm:$0xf] %vm929_vm4, %v876_v8  ;;  %v3600_v8 = vpack.c.bf16 %v3591_v62, %v3591_v62 }
 0x108   : > { %1044 = vrot.lane.b32.xlu1 %v3396_v10, %s2654_s4  ;;  %4554 = vst [vmem:[#allocation59_spill] sm:$0xff] %v3600_v8 }
 0x109   : > { %1042 = vrot.lane.b32.xlu0 %v3403_v6, %s2654_s4 }
 0x10a   : > { %v862_v45 = vpop.permute.xlu1 %861 }
 0x10b   : > { %944 = vst.msk [vmem:[#allocation2 + $0x38] sm:$0xf] %vm929_vm4, %v862_v45  ;;  %v860_v49 = vpop.permute.xlu0 %859  ;;  %1046 = vrot.lane.b32.xlu2 %v3449_v33, %s2654_s4  ;;  %v4561_v33 = vld [vmem:[#allocation11_spill] sm:$0xff] }
 0x10c   : > { %943 = vst.msk [vmem:[#allocation2 + $0x34] sm:$0xf] %vm929_vm4, %v860_v49 }
 0x10d   : > { %v882_v18 = vpop.permute.xlu2 %881 }
 0x10e   : > { %954 = vst.msk [vmem:[#allocation2 + $0x60] sm:$0xf] %vm929_vm4, %v882_v18  ;;  %v4555_v18 = vld [vmem:[#allocation6_spill] sm:$0xff] }
 0x110   : > { %1050 = vrot.lane.b32.xlu1 %v3436_v51, %s2654_s4 }
 0x111   : > { %1048 = vrot.lane.b32.xlu0 %v3443_v36, %s2654_s4 }
 0x112   : > { %v868_v26 = vpop.permute.xlu1 %867 }
 0x113   : > { %947 = vst.msk [vmem:[#allocation2 + $0x44] sm:$0xf] %vm929_vm4, %v868_v26  ;;  %v866_v53 = vpop.permute.xlu0 %865  ;;  %1052 = vrot.lane.b32.xlu2 %v3481_v14, %s2654_s4  ;;  %v4567_v14 = vld [vmem:[#allocation17_spill] sm:$0xff] }
 0x114   : > { %946 = vst.msk [vmem:[#allocation2 + $0x40] sm:$0xf] %vm929_vm4, %v866_v53 }
 0x115   : > { %v888_v56 = vpop.permute.xlu2 %887 }
 0x116   : > { %957 = vst.msk [vmem:[#allocation2 + $0x6c] sm:$0xf] %vm929_vm4, %v888_v56  ;;  %v4556_v56 = vld [vmem:[#allocation7_spill] sm:$0xff] }
 0x118   : > { %1056 = vrot.lane.b32.xlu1 %v3586_v63, %s2654_s4 }
 0x119   : > { %1054 = vrot.lane.b32.xlu0 %v3474_v60, %s2654_s4 }
 0x11a   : > { %v874_v27 = vpop.permute.xlu1 %873 }
 0x11b   : > { %950 = vst.msk [vmem:[#allocation2 + $0x50] sm:$0xf] %vm929_vm4, %v874_v27  ;;  %v872_v45 = vpop.permute.xlu0 %871  ;;  %1058 = vrot.lane.b32.xlu2 %v3600_v8, %s2654_s4  ;;  %v4557_v27 = vld [vmem:[#allocation10_spill] sm:$0xff]  ;;  %s2509_s4 = sshll.u32 %s2701_s16, 1  ;;  %s2310_s16 = scalar_lea.sflag [#allocation4], %s169_s24 }
 0x11c   : > { %949 = vst.msk [vmem:[#allocation2 + $0x4c] sm:$0xf] %vm929_vm4, %v872_v45  ;;  %v4558_v45 = vld [vmem:[#allocation8_spill] sm:$0xff] }
 0x11d   : > { %v894_v49 = vpop.permute.xlu2 %893 }
 0x11e   : > { %960 = vst.msk [vmem:[#allocation2 + $0x78] sm:$0xf] %vm929_vm4, %v894_v49 }
 0x120   : > { %1141 = vrot.lane.b32.xlu1 %v2793_v28, %s2655_s5 }
 0x121   : > { %1139 = vrot.lane.b32.xlu0 %v4555_v18, %s2655_s5 }
 0x122   : > { %v880_v26 = vpop.permute.xlu1 %879 }
 0x123   : > { %953 = vst.msk [vmem:[#allocation2 + $0x5c] sm:$0xf] %vm929_vm4, %v880_v26  ;;  %v878_v53 = vpop.permute.xlu0 %877  ;;  %1143 = vrot.lane.b32.xlu2 %v4556_v56, %s2655_s5  ;;  %v4559_v26 = vld [vmem:[#allocation9_spill] sm:$0xff] }
 0x124   : > { %952 = vst.msk [vmem:[#allocation2 + $0x58] sm:$0xf] %vm929_vm4, %v878_v53  ;;  %v4560_v53 = vld [vmem:[#allocation13_spill] sm:$0xff] }
 0x125   : > { %v999_v28 = vpop.permute.xlu2 %998 }
 0x126   : > { %1094 = vst.msk [vmem:[#allocation2 + $0x4] sm:$0xf] %vm1092_vm5, %v999_v28 }
 0x128   : > { %1147 = vrot.lane.b32.xlu1 %v4557_v27, %s2655_s5 }
 0x129   : > { %1145 = vrot.lane.b32.xlu0 %v4558_v45, %s2655_s5 }
 0x12a   : > { %v886_v49 = vpop.permute.xlu1 %885 }
 0x12b   : > { %956 = vst.msk [vmem:[#allocation2 + $0x68] sm:$0xf] %vm929_vm4, %v886_v49  ;;  %v884_v18 = vpop.permute.xlu0 %883  ;;  %1149 = vrot.lane.b32.xlu2 %v4559_v26, %s2655_s5  ;;  %v4562_v49 = vld [vmem:[#allocation12_spill] sm:$0xff] }
 0x12c   : > { %955 = vst.msk [vmem:[#allocation2 + $0x64] sm:$0xf] %vm929_vm4, %v884_v18  ;;  %v4563_v18 = vld [vmem:[#allocation16_spill] sm:$0xff] }
 0x12d   : > { %v1005_v8 = vpop.permute.xlu2 %1004 }
 0x12e   : > { %1097 = vst.msk [vmem:[#allocation2 + $0x10] sm:$0xf] %vm1092_vm5, %v1005_v8 }
 0x130   : > { %1153 = vrot.lane.b32.xlu1 %v4560_v53, %s2655_s5 }
 0x131   : > { %1151 = vrot.lane.b32.xlu0 %v4561_v33, %s2655_s5 }
 0x132   : > { %v892_v63 = vpop.permute.xlu1 %891 }
 0x133   : > { %959 = vst.msk [vmem:[#allocation2 + $0x74] sm:$0xf] %vm929_vm4, %v892_v63  ;;  %v890_v28 = vpop.permute.xlu0 %889  ;;  %1155 = vrot.lane.b32.xlu2 %v4562_v49, %s2655_s5  ;;  %v4565_v63 = vld [vmem:[#allocation15_spill] sm:$0xff]  ;;  %v4572_v49 = vld [vmem:[#allocation25_spill] sm:$0xff] }
 0x134   : > { %958 = vst.msk [vmem:[#allocation2 + $0x70] sm:$0xf] %vm929_vm4, %v890_v28  ;;  %v4566_v28 = vld [vmem:[#allocation19_spill] sm:$0xff] }
 0x135   : > { %v1011_v10 = vpop.permute.xlu2 %1010 }
 0x136   : > { %1100 = vst.msk [vmem:[#allocation2 + $0x1c] sm:$0xf] %vm1092_vm5, %v1011_v10 }
 0x138   : > { %1159 = vrot.lane.b32.xlu1 %v4563_v18, %s2655_s5 }
 0x139   : > { %1157 = vrot.lane.b32.xlu0 %v4564_v11, %s2655_s5  ;;  %v1129_v11 = vrot.slane %v3591_v62, 1  ;;  %v4576_v62 = vld [vmem:[#allocation26_spill] sm:$0xff] }
 0x13a   : > { %v997_v20 = vpop.permute.xlu1 %996 }
 0x13b   : > { %1093 = vst.msk [vmem:[#allocation2] sm:$0xf] %vm1092_vm5, %v997_v20  ;;  %v896_v8 = vpop.permute.xlu0 %895  ;;  %1161 = vrot.lane.b32.xlu2 %v4565_v63, %s2655_s5  ;;  %v4568_v20 = vld [vmem:[#allocation18_spill] sm:$0xff] }
 0x13c   : > { %961 = vst.msk [vmem:[#allocation2 + $0x7c] sm:$0xf] %vm929_vm4, %v896_v8  ;;  %v4569_v8 = vld [vmem:[#allocation22_spill] sm:$0xff] }
 0x13d   : > { %v1017_v32 = vpop.permute.xlu2 %1016 }
 0x13e   : > { %1103 = vst.msk [vmem:[#allocation2 + $0x28] sm:$0xf] %vm1092_vm5, %v1017_v32  ;;  %v1128_v32 = vrot.slane %v3579_v19, 1 }
 0x140   : > { %1165 = vrot.lane.b32.xlu1 %v4566_v28, %s2655_s5 }
 0x141   : > { %1163 = vrot.lane.b32.xlu0 %v4567_v14, %s2655_s5 }
 0x142   : > { %v1003_v60 = vpop.permute.xlu1 %1002 }
 0x143   : > { %1096 = vst.msk [vmem:[#allocation2 + $0xc] sm:$0xf] %vm1092_vm5, %v1003_v60  ;;  %v1001_v10 = vpop.permute.xlu0 %1000  ;;  %1167 = vrot.lane.b32.xlu2 %v4568_v20, %s2655_s5  ;;  %v4571_v20 = vld [vmem:[#allocation21_spill] sm:$0xff] }
 0x144   : > { %1095 = vst.msk [vmem:[#allocation2 + $0x8] sm:$0xf] %vm1092_vm5, %v1001_v10 }
 0x145   : > { %v1023_v6 = vpop.permute.xlu2 %1022 }
 0x146   : > { %1106 = vst.msk [vmem:[#allocation2 + $0x34] sm:$0xf] %vm1092_vm5, %v1023_v6  ;;  %v4573_v6 = vld [vmem:[#allocation23_spill] sm:$0xff] }
 0x148   : > { %1171 = vrot.lane.b32.xlu1 %v4569_v8, %s2655_s5  ;;  %v1130_v8 = vsel %vm350_vm0, %v1128_v32, %v1129_v11  ;;  %v4575_v32 = vld [vmem:[#allocation28_spill] sm:$0xff] }
 0x149   : > { %1169 = vrot.lane.b32.xlu0 %v4570_v52, %s2655_s5 }
 0x14a   : > { %v1009_v60 = vpop.permute.xlu1 %1008 }
 0x14b   : > { %1099 = vst.msk [vmem:[#allocation2 + $0x18] sm:$0xf] %vm1092_vm5, %v1009_v60  ;;  %v1007_v10 = vpop.permute.xlu0 %1006  ;;  %1173 = vrot.lane.b32.xlu2 %v4571_v20, %s2655_s5 }
 0x14c   : > { %1098 = vst.msk [vmem:[#allocation2 + $0x14] sm:$0xf] %vm1092_vm5, %v1007_v10  ;;  %v4574_v10 = vld [vmem:[#allocation24_spill] sm:$0xff] }
 0x14d   : > { %v1029_v52 = vpop.permute.xlu2 %1028 }
 0x14e   : > { %1109 = vst.msk [vmem:[#allocation2 + $0x40] sm:$0xf] %vm1092_vm5, %v1029_v52 }
 0x150   : > { %1177 = vrot.lane.b32.xlu1 %v4572_v49, %s2655_s5 }
 0x151   : > { %1175 = vrot.lane.b32.xlu0 %v4573_v6, %s2655_s5 }
 0x152   : > { %v1015_v19 = vpop.permute.xlu1 %1014 }
 0x153   : > { %1102 = vst.msk [vmem:[#allocation2 + $0x24] sm:$0xf] %vm1092_vm5, %v1015_v19  ;;  %v1013_v60 = vpop.permute.xlu0 %1012  ;;  %1179 = vrot.lane.b32.xlu2 %v4574_v10, %s2655_s5 }
 0x154   : > { %1101 = vst.msk [vmem:[#allocation2 + $0x20] sm:$0xf] %vm1092_vm5, %v1013_v60  ;;  %v4577_v60 = vld [vmem:[#allocation27_spill] sm:$0xff] }
 0x155   : > { %v1035_v20 = vpop.permute.xlu2 %1034 }
 0x156   : > { %1112 = vst.msk [vmem:[#allocation2 + $0x4c] sm:$0xf] %vm1092_vm5, %v1035_v20  ;;  %v3687_v20 = vld [vmem:[%s2736_s28 + $0x190] sm:$0x3] }
 0x157   : > { %4579 = vst [vmem:[#allocation6_spill] sm:$0xff] %v3687_v20 }
 0x158   : > { %1183 = vrot.lane.b32.xlu1 %v4575_v32, %s2655_s5  ;;  %v4578_v32 = vld [vmem:[#allocation29_spill] sm:$0xff] }
 0x159   : > { %1181 = vrot.lane.b32.xlu0 %v4576_v62, %s2655_s5 }
 0x15a   : > { %v1021_v52 = vpop.permute.xlu1 %1020 }
 0x15b   : > { %1105 = vst.msk [vmem:[#allocation2 + $0x30] sm:$0xf] %vm1092_vm5, %v1021_v52  ;;  %v1019_v19 = vpop.permute.xlu0 %1018  ;;  %1185 = vrot.lane.b32.xlu2 %v4577_v60, %s2655_s5  ;;  %v4580_v60 = vld [vmem:[#allocation30_spill] sm:$0xff] }
 0x15c   : > { %1104 = vst.msk [vmem:[#allocation2 + $0x2c] sm:$0xf] %vm1092_vm5, %v1019_v19  ;;  %v1131_v19 = vrot.slane %v3687_v20, 1  ;;  %v3704_v20 = vpack.c.bf16 %v1130_v8, %v1130_v8 }
 0x15d   : > { %v1041_v2 = vpop.permute.xlu2 %1040 }
 0x15e   : > { %1115 = vst.msk [vmem:[#allocation2 + $0x58] sm:$0xf] %vm1092_vm5, %v1041_v2  ;;  %v1132_v2 = vsel %vm350_vm0, %v1129_v11, %v1131_v19 }
 0x15f   : > { %4582 = vst [vmem:[#allocation10_spill] sm:$0xff] %v3704_v20 }
 0x160   : > { %1189 = vrot.lane.b32.xlu1 %v3058_v41, %s2655_s5 }
 0x161   : > { %1187 = vrot.lane.b32.xlu0 %v4578_v32, %s2655_s5  ;;  %v3702_v32 = vpack.c.bf16 %v1132_v2, %v1132_v2 }
 0x162   : > { %v1027_v48 = vpop.permute.xlu1 %1026 }
 0x163   : > { %1108 = vst.msk [vmem:[#allocation2 + $0x3c] sm:$0xf] %vm1092_vm5, %v1027_v48  ;;  %v1025_v52 = vpop.permute.xlu0 %1024  ;;  %1191 = vrot.lane.b32.xlu2 %v4580_v60, %s2655_s5 }
 0x164   : > { %1107 = vst.msk [vmem:[#allocation2 + $0x38] sm:$0xf] %vm1092_vm5, %v1025_v52 }
 0x165   : > { %v1047_v41 = vpop.permute.xlu2 %1046  ;;  %4581 = vst [vmem:[#allocation7_spill] sm:$0xff] %v3702_v32 }
 0x166   : > { %1118 = vst.msk [vmem:[#allocation2 + $0x64] sm:$0xf] %vm1092_vm5, %v1047_v41 }
 0x168   : > { %1195 = vrot.lane.b32.xlu1 %v3077_v13, %s2655_s5  ;;  %v4583_v13 = vld [vmem:[#allocation32_spill] sm:$0xff] }
 0x169   : > { %1193 = vrot.lane.b32.xlu0 %v3072_v58, %s2655_s5 }
 0x16a   : > { %v1033_v48 = vpop.permute.xlu1 %1032 }
 0x16b   : > { %1111 = vst.msk [vmem:[#allocation2 + $0x48] sm:$0xf] %vm1092_vm5, %v1033_v48  ;;  %v1031_v52 = vpop.permute.xlu0 %1030  ;;  %1197 = vrot.lane.b32.xlu2 %v4583_v13, %s2655_s5 }
 0x16c   : > { %1110 = vst.msk [vmem:[#allocation2 + $0x44] sm:$0xf] %vm1092_vm5, %v1031_v52  ;;  %v4584_v52 = vld [vmem:[#allocation35_spill] sm:$0xff] }
 0x16d   : > { %v1053_v59 = vpop.permute.xlu2 %1052 }
 0x16e   : > { %1121 = vst.msk [vmem:[#allocation2 + $0x70] sm:$0xf] %vm1092_vm5, %v1053_v59 }
 0x170   : > { %1201 = vrot.lane.b32.xlu1 %v3702_v32, %s2655_s5  ;;  %v4590_v32 = vld [vmem:[#allocation45_spill] sm:$0xff] }
 0x171   : > { %1199 = vrot.lane.b32.xlu0 %v3704_v20, %s2655_s5 }
 0x172   : > { %v1039_v41 = vpop.permute.xlu1 %1038 }
 0x173   : > { %1114 = vst.msk [vmem:[#allocation2 + $0x54] sm:$0xf] %vm1092_vm5, %v1039_v41  ;;  %v1037_v11 = vpop.permute.xlu0 %1036  ;;  %1279 = vrot.lane.b32.xlu2 %v3105_v47, %s2656_s6 }
 0x174   : > { %1113 = vst.msk [vmem:[#allocation2 + $0x50] sm:$0xf] %vm1092_vm5, %v1037_v11 }
 0x175   : > { %v1059_v8 = vpop.permute.xlu2 %1058 }
 0x176   : > { %1124 = vst.msk [vmem:[#allocation2 + $0x7c] sm:$0xf] %vm1092_vm5, %v1059_v8  ;;  %v4585_v8 = vld [vmem:[#allocation36_spill] sm:$0xff] }
 0x178   : > { %1283 = vrot.lane.b32.xlu1 %v3141_v1, %s2656_s6 }
 0x179   : > { %1281 = vrot.lane.b32.xlu0 %v3130_v31, %s2656_s6 }
 0x17a   : > { %v1045_v59 = vpop.permute.xlu1 %1044 }
 0x17b   : > { %1117 = vst.msk [vmem:[#allocation2 + $0x60] sm:$0xf] %vm1092_vm5, %v1045_v59  ;;  %v1043_v19 = vpop.permute.xlu0 %1042  ;;  %1285 = vrot.lane.b32.xlu2 %v3135_v29, %s2656_s6 }
 0x17c   : > { %1116 = vst.msk [vmem:[#allocation2 + $0x5c] sm:$0xf] %vm1092_vm5, %v1043_v19 }
 0x17d   : > { %v1144_v47 = vpop.permute.xlu2 %1143 }
 0x17e   : > { %1238 = vst.msk [vmem:[#allocation2 + $0x8] sm:$0xf] %vm1235_vm6, %v1144_v47 }
 0x180   : > { %1289 = vrot.lane.b32.xlu1 %v3179_v25, %s2656_s6 }
 0x181   : > { %1287 = vrot.lane.b32.xlu0 %v3168_v12, %s2656_s6 }
 0x182   : > { %v1051_v31 = vpop.permute.xlu1 %1050 }
 0x183   : > { %1120 = vst.msk [vmem:[#allocation2 + $0x6c] sm:$0xf] %vm1092_vm5, %v1051_v31  ;;  %v1049_v2 = vpop.permute.xlu0 %1048  ;;  %1291 = vrot.lane.b32.xlu2 %v3173_v9, %s2656_s6  ;;  %v4586_v31 = vld [vmem:[#allocation41_spill] sm:$0xff] }
 0x184   : > { %1119 = vst.msk [vmem:[#allocation2 + $0x68] sm:$0xf] %vm1092_vm5, %v1049_v2 }
 0x185   : > { %v1150_v48 = vpop.permute.xlu2 %1149 }
 0x186   : > { %1241 = vst.msk [vmem:[#allocation2 + $0x14] sm:$0xf] %vm1235_vm6, %v1150_v48  ;;  %v4587_v48 = vld [vmem:[#allocation38_spill] sm:$0xff] }
 0x188   : > { %1295 = vrot.lane.b32.xlu1 %v3215_v38, %s2656_s6 }
 0x189   : > { %1293 = vrot.lane.b32.xlu0 %v4584_v52, %s2656_s6 }
 0x18a   : > { %v1057_v41 = vpop.permute.xlu1 %1056 }
 0x18b   : > { %1123 = vst.msk [vmem:[#allocation2 + $0x78] sm:$0xf] %vm1092_vm5, %v1057_v41  ;;  %v1055_v11 = vpop.permute.xlu0 %1054  ;;  %1297 = vrot.lane.b32.xlu2 %v4585_v8, %s2656_s6 }
 0x18c   : > { %1122 = vst.msk [vmem:[#allocation2 + $0x74] sm:$0xf] %vm1092_vm5, %v1055_v11 }
 0x18d   : > { %v1156_v59 = vpop.permute.xlu2 %1155 }
 0x18e   : > { %1244 = vst.msk [vmem:[#allocation2 + $0x20] sm:$0xf] %vm1235_vm6, %v1156_v59  ;;  %v4588_v59 = vld [vmem:[#allocation40_spill] sm:$0xff] }
 0x190   : > { %1301 = vrot.lane.b32.xlu1 %v3252_v35, %s2656_s6 }
 0x191   : > { %1299 = vrot.lane.b32.xlu0 %v3237_v44, %s2656_s6 }
 0x192   : > { %v1142_v19 = vpop.permute.xlu1 %1141 }
 0x193   : > { %1237 = vst.msk [vmem:[#allocation2 + $0x4] sm:$0xf] %vm1235_vm6, %v1142_v19  ;;  %v1140_v47 = vpop.permute.xlu0 %1139  ;;  %1303 = vrot.lane.b32.xlu2 %v3250_v4, %s2656_s6 }
 0x194   : > { %1236 = vst.msk [vmem:[#allocation2] sm:$0xf] %vm1235_vm6, %v1140_v47 }
 0x195   : > { %v1162_v2 = vpop.permute.xlu2 %1161 }
 0x196   : > { %1247 = vst.msk [vmem:[#allocation2 + $0x2c] sm:$0xf] %vm1235_vm6, %v1162_v2 }
 0x198   : > { %1307 = vrot.lane.b32.xlu1 %v4586_v31, %s2656_s6 }
 0x199   : > { %1305 = vrot.lane.b32.xlu0 %v4587_v48, %s2656_s6 }
 0x19a   : > { %v1148_v41 = vpop.permute.xlu1 %1147 }
 0x19b   : > { %1240 = vst.msk [vmem:[#allocation2 + $0x10] sm:$0xf] %vm1235_vm6, %v1148_v41  ;;  %v1146_v11 = vpop.permute.xlu0 %1145  ;;  %1309 = vrot.lane.b32.xlu2 %v4588_v59, %s2656_s6  ;;  %v4589_v41 = vld [vmem:[#allocation47_spill] sm:$0xff] }
 0x19c   : > { %1239 = vst.msk [vmem:[#allocation2 + $0xc] sm:$0xf] %vm1235_vm6, %v1146_v11 }
 0x19d   : > { %v1168_v19 = vpop.permute.xlu2 %1167 }
 0x19e   : > { %1250 = vst.msk [vmem:[#allocation2 + $0x38] sm:$0xf] %vm1235_vm6, %v1168_v19 }
 0x1a0   : > { %1313 = vrot.lane.b32.xlu1 %v3333_v57, %s2656_s6 }
 0x1a1   : > { %1311 = vrot.lane.b32.xlu0 %v3318_v55, %s2656_s6 }
 0x1a2   : > { %v1154_v47 = vpop.permute.xlu1 %1153 }
 0x1a3   : > { %1243 = vst.msk [vmem:[#allocation2 + $0x1c] sm:$0xf] %vm1235_vm6, %v1154_v47  ;;  %v1152_v2 = vpop.permute.xlu0 %1151  ;;  %1315 = vrot.lane.b32.xlu2 %v3331_v61, %s2656_s6  ;;  %v4591_v47 = vld [vmem:[#allocation46_spill] sm:$0xff] }
 0x1a4   : > { %1242 = vst.msk [vmem:[#allocation2 + $0x18] sm:$0xf] %vm1235_vm6, %v1152_v2 }
 0x1a5   : > { %v1174_v11 = vpop.permute.xlu2 %1173 }
 0x1a6   : > { %1253 = vst.msk [vmem:[#allocation2 + $0x44] sm:$0xf] %vm1235_vm6, %v1174_v11 }
 0x1a8   : > { %1319 = vrot.lane.b32.xlu1 %v4589_v41, %s2656_s6 }
 0x1a9   : > { %1317 = vrot.lane.b32.xlu0 %v4590_v32, %s2656_s6 }
 0x1aa   : > { %v1160_v20 = vpop.permute.xlu1 %1159 }
 0x1ab   : > { %1246 = vst.msk [vmem:[#allocation2 + $0x28] sm:$0xf] %vm1235_vm6, %v1160_v20  ;;  %v1158_v19 = vpop.permute.xlu0 %1157  ;;  %1321 = vrot.lane.b32.xlu2 %v4591_v47, %s2656_s6 }
 0x1ac   : > { %1245 = vst.msk [vmem:[#allocation2 + $0x24] sm:$0xf] %vm1235_vm6, %v1158_v19 }
 0x1ad   : > { %v1180_v2 = vpop.permute.xlu2 %1179 }
 0x1ae   : > { %1256 = vst.msk [vmem:[#allocation2 + $0x50] sm:$0xf] %vm1235_vm6, %v1180_v2 }
 0x1b0   : > { %1325 = vrot.lane.b32.xlu1 %v3414_v46, %s2656_s6 }
 0x1b1   : > { %1323 = vrot.lane.b32.xlu0 %v3399_v39, %s2656_s6 }
 0x1b2   : > { %v1166_v57 = vpop.permute.xlu1 %1165 }
 0x1b3   : > { %1249 = vst.msk [vmem:[#allocation2 + $0x34] sm:$0xf] %vm1235_vm6, %v1166_v57  ;;  %v1164_v11 = vpop.permute.xlu0 %1163  ;;  %1327 = vrot.lane.b32.xlu2 %v3412_v43, %s2656_s6  ;;  %v4592_v57 = vld [vmem:[#allocation52_spill] sm:$0xff] }
 0x1b4   : > { %1248 = vst.msk [vmem:[#allocation2 + $0x30] sm:$0xf] %vm1235_vm6, %v1164_v11 }
 0x1b5   : > { %v1186_v20 = vpop.permute.xlu2 %1185 }
 0x1b6   : > { %1259 = vst.msk [vmem:[#allocation2 + $0x5c] sm:$0xf] %vm1235_vm6, %v1186_v20 }
 0x1b8   : > { %1331 = vrot.lane.b32.xlu1 %v3454_v37, %s2656_s6 }
 0x1b9   : > { %1329 = vrot.lane.b32.xlu0 %v3439_v16, %s2656_s6 }
 0x1ba   : > { %v1172_v19 = vpop.permute.xlu1 %1171 }
 0x1bb   : > { %1252 = vst.msk [vmem:[#allocation2 + $0x40] sm:$0xf] %vm1235_vm6, %v1172_v19  ;;  %v1170_v2 = vpop.permute.xlu0 %1169  ;;  %1333 = vrot.lane.b32.xlu2 %v4592_v57, %s2656_s6 }
 0x1bc   : > { %1251 = vst.msk [vmem:[#allocation2 + $0x3c] sm:$0xf] %vm1235_vm6, %v1170_v2 }
 0x1bd   : > { %v1192_v11 = vpop.permute.xlu2 %1191 }
 0x1be   : > { %1262 = vst.msk [vmem:[#allocation2 + $0x68] sm:$0xf] %vm1235_vm6, %v1192_v11 }
 0x1c0   : > { %1412 = vrot.lane.b32.xlu1 %v3093_v15, %s2657_s7 }
 0x1c1   : > { %1335 = vrot.lane.b32.xlu0 %v3477_v3, %s2656_s6 }
 0x1c2   : > { %v1178_v20 = vpop.permute.xlu1 %1177 }
 0x1c3   : > { %1255 = vst.msk [vmem:[#allocation2 + $0x4c] sm:$0xf] %vm1235_vm6, %v1178_v20  ;;  %v1176_v19 = vpop.permute.xlu0 %1175  ;;  %1414 = vrot.lane.b32.xlu2 %v3121_v34, %s2657_s7  ;;  %v1860_v20 = vld [vmem:[%s4404_s1 + $0x10] sm:$0x3] }
 0x1c4   : > { %1254 = vst.msk [vmem:[#allocation2 + $0x48] sm:$0xf] %vm1235_vm6, %v1176_v19 }
 0x1c5   : > { %v1198_v15 = vpop.permute.xlu2 %1197 }
 0x1c6   : > { %1265 = vst.msk [vmem:[#allocation2 + $0x74] sm:$0xf] %vm1235_vm6, %v1198_v15 }
 0x1c8   : > { %1557 = vrot.lane.b32.xlu1 %v4558_v45, %s2658_s8 }
 0x1c9   : > { %1555 = vrot.lane.b32.xlu0 %v4556_v56, %s2658_s8 }
 0x1ca   : > { %v1184_v2 = vpop.permute.xlu1 %1183 }
 0x1cb   : > { %1258 = vst.msk [vmem:[#allocation2 + $0x58] sm:$0xf] %vm1235_vm6, %v1184_v2  ;;  %v1182_v11 = vpop.permute.xlu0 %1181  ;;  %1695 = vrot.lane.b32.xlu2 %v3141_v1, %s2659_s9 }
 0x1cc   : > { %1257 = vst.msk [vmem:[#allocation2 + $0x54] sm:$0xf] %vm1235_vm6, %v1182_v11 }
 0x1cd   : > { %v1280_v34 = vpop.permute.xlu2 %1279 }
 0x1ce   : > { %1376 = vst.msk [vmem:[#allocation2] sm:$0xf] %vm1375_vm7, %v1280_v34 }
 0x1d0   : > { %1416 = vrot.lane.b32.xlu1 %v3165_v7, %s2657_s7 }
 0x1d1   : > { %1697 = vrot.lane.b32.xlu0 %v3135_v29, %s2659_s9 }
 0x1d2   : > { %v1190_v56 = vpop.permute.xlu1 %1189 }
 0x1d3   : > { %1261 = vst.msk [vmem:[#allocation2 + $0x64] sm:$0xf] %vm1235_vm6, %v1190_v56  ;;  %v1188_v45 = vpop.permute.xlu0 %1187  ;;  %1418 = vrot.lane.b32.xlu2 %v3161_v0, %s2657_s7  ;;  %v4593_v56 = vld [vmem:[#allocation34_spill] sm:$0xff] }
 0x1d4   : > { %1260 = vst.msk [vmem:[#allocation2 + $0x60] sm:$0xf] %vm1235_vm6, %v1188_v45 }
 0x1d5   : > { %v1286_v1 = vpop.permute.xlu2 %1285 }
 0x1d6   : > { %1379 = vst.msk [vmem:[#allocation2 + $0xc] sm:$0xf] %vm1375_vm7, %v1286_v1 }
 0x1d8   : > { %1430 = vrot.lane.b32.xlu1 %v3241_v30, %s2657_s7 }
 0x1d9   : > { %1428 = vrot.lane.b32.xlu0 %v3247_v42, %s2657_s7 }
 0x1da   : > { %v1196_v29 = vpop.permute.xlu1 %1195 }
 0x1db   : > { %1264 = vst.msk [vmem:[#allocation2 + $0x70] sm:$0xf] %vm1235_vm6, %v1196_v29  ;;  %v1194_v7 = vpop.permute.xlu0 %1193  ;;  %1559 = vrot.lane.b32.xlu2 %v4557_v27, %s2658_s8 }
 0x1dc   : > { %1263 = vst.msk [vmem:[#allocation2 + $0x6c] sm:$0xf] %vm1235_vm6, %v1194_v7  ;;  %v4596_v7 = vld [vmem:[#allocation12_spill] sm:$0xff] }
 0x1dd   : > { %v1292_v0 = vpop.permute.xlu2 %1291 }
 0x1de   : > { %1382 = vst.msk [vmem:[#allocation2 + $0x18] sm:$0xf] %vm1375_vm7, %v1292_v0  ;;  %v4597_v0 = vld [vmem:[#allocation18_spill] sm:$0xff] }
 0x1e0   : > { %1571 = vrot.lane.b32.xlu1 %v4563_v18, %s2658_s8 }
 0x1e1   : > { %1561 = vrot.lane.b32.xlu0 %v4559_v26, %s2658_s8 }
 0x1e2   : > { %v1202_v30 = vpop.permute.xlu1 %1201 }
 0x1e3   : > { %1267 = vst.msk [vmem:[#allocation2 + $0x7c] sm:$0xf] %vm1235_vm6, %v1202_v30  ;;  %v1200_v42 = vpop.permute.xlu0 %1199  ;;  %1573 = vrot.lane.b32.xlu2 %v4565_v63, %s2658_s8 }
 0x1e4   : > { %1266 = vst.msk [vmem:[#allocation2 + $0x78] sm:$0xf] %vm1235_vm6, %v1200_v42  ;;  %v4598_v42 = vld [vmem:[#allocation14_spill] sm:$0xff] }
 0x1e5   : > { %v1298_v27 = vpop.permute.xlu2 %1297 }
 0x1e6   : > { %1385 = vst.msk [vmem:[#allocation2 + $0x24] sm:$0xf] %vm1375_vm7, %v1298_v27 }
 0x1e8   : > { %1701 = vrot.lane.b32.xlu1 %v3179_v25, %s2659_s9 }
 0x1e9   : > { %1699 = vrot.lane.b32.xlu0 %v3168_v12, %s2659_s9 }
 0x1ea   : > { %v1284_v26 = vpop.permute.xlu1 %1283 }
 0x1eb   : > { %1378 = vst.msk [vmem:[#allocation2 + $0x8] sm:$0xf] %vm1375_vm7, %v1284_v26  ;;  %v1282_v18 = vpop.permute.xlu0 %1281  ;;  %1711 = vrot.lane.b32.xlu2 %v3237_v44, %s2659_s9 }
 0x1ec   : > { %1377 = vst.msk [vmem:[#allocation2 + $0x4] sm:$0xf] %vm1375_vm7, %v1282_v18  ;;  %v4599_v18 = vld [vmem:[#allocation20_spill] sm:$0xff] }
 0x1ed   : > { %v1304_v63 = vpop.permute.xlu2 %1303 }
 0x1ee   : > { %1388 = vst.msk [vmem:[#allocation2 + $0x30] sm:$0xf] %vm1375_vm7, %v1304_v63 }
 0x1f0   : > { %1444 = vrot.lane.b32.xlu1 %v3315_v40, %s2657_s7 }
 0x1f1   : > { %1713 = vrot.lane.b32.xlu0 %v3252_v35, %s2659_s9 }
 0x1f2   : > { %v1290_v12 = vpop.permute.xlu1 %1289 }
 0x1f3   : > { %1381 = vst.msk [vmem:[#allocation2 + $0x14] sm:$0xf] %vm1375_vm7, %v1290_v12  ;;  %v1288_v25 = vpop.permute.xlu0 %1287  ;;  %1446 = vrot.lane.b32.xlu2 %v3368_v22, %s2657_s7 }
 0x1f4   : > { %1380 = vst.msk [vmem:[#allocation2 + $0x10] sm:$0xf] %vm1375_vm7, %v1288_v25 }
 0x1f5   : > { %v1310_v44 = vpop.permute.xlu2 %1309 }
 0x1f6   : > { %1391 = vst.msk [vmem:[#allocation2 + $0x3c] sm:$0xf] %vm1375_vm7, %v1310_v44  ;;  %v4600_v44 = vld [vmem:[#allocation50_spill] sm:$0xff] }
 0x1f8   : > { %1589 = vrot.lane.b32.xlu1 %v4572_v49, %s2658_s8 }
 0x1f9   : > { %1587 = vrot.lane.b32.xlu0 %v4573_v6, %s2658_s8 }
 0x1fa   : > { %v1296_v35 = vpop.permute.xlu1 %1295 }
 0x1fb   : > { %1384 = vst.msk [vmem:[#allocation2 + $0x20] sm:$0xf] %vm1375_vm7, %v1296_v35  ;;  %v1294_v40 = vpop.permute.xlu0 %1293  ;;  %1727 = vrot.lane.b32.xlu2 %v3331_v61, %s2659_s9 }
 0x1fc   : > { %1383 = vst.msk [vmem:[#allocation2 + $0x1c] sm:$0xf] %vm1375_vm7, %v1294_v40 }
 0x1fd   : > { %v1316_v22 = vpop.permute.xlu2 %1315 }
 0x1fe   : > { %1394 = vst.msk [vmem:[#allocation2 + $0x48] sm:$0xf] %vm1375_vm7, %v1316_v22  ;;  %v4602_v22 = vld [vmem:[#allocation53_spill] sm:$0xff] }
 0x200   : > { %1420 = vrot.lane.b32.xlu1 %v3157_v24, %s2657_s7 }
 0x201   : > { %1729 = vrot.lane.b32.xlu0 %v4590_v32, %s2659_s9 }
 0x202   : > { %v1302_v49 = vpop.permute.xlu1 %1301 }
 0x203   : > { %1387 = vst.msk [vmem:[#allocation2 + $0x2c] sm:$0xf] %vm1375_vm7, %v1302_v49  ;;  %v1300_v6 = vpop.permute.xlu0 %1299  ;;  %1422 = vrot.lane.b32.xlu2 %v3203_v21, %s2657_s7 }
 0x204   : > { %1386 = vst.msk [vmem:[#allocation2 + $0x28] sm:$0xf] %vm1375_vm7, %v1300_v6 }
 0x205   : > { %v1322_v61 = vpop.permute.xlu2 %1321 }
 0x206   : > { %1397 = vst.msk [vmem:[#allocation2 + $0x54] sm:$0xf] %vm1375_vm7, %v1322_v61 }
 0x208   : > { %1434 = vrot.lane.b32.xlu1 %v3287_v17, %s2657_s7 }
 0x209   : > { %1432 = vrot.lane.b32.xlu0 %v3234_v5, %s2657_s7 }
 0x20a   : > { %v1308_v24 = vpop.permute.xlu1 %1307 }
 0x20b   : > { %1390 = vst.msk [vmem:[#allocation2 + $0x38] sm:$0xf] %vm1375_vm7, %v1308_v24  ;;  %v1306_v32 = vpop.permute.xlu0 %1305  ;;  %1563 = vrot.lane.b32.xlu2 %v4561_v33, %s2658_s8 }
 0x20c   : > { %1389 = vst.msk [vmem:[#allocation2 + $0x34] sm:$0xf] %vm1375_vm7, %v1306_v32  ;;  %v4604_v32 = vld [vmem:[#allocation28_spill] sm:$0xff] }
 0x20d   : > { %v1328_v21 = vpop.permute.xlu2 %1327 }
 0x20e   : > { %1400 = vst.msk [vmem:[#allocation2 + $0x60] sm:$0xf] %vm1375_vm7, %v1328_v21  ;;  %v4605_v21 = vld [vmem:[#allocation33_spill] sm:$0xff] }
 0x210   : > { %1575 = vrot.lane.b32.xlu1 %v4567_v14, %s2658_s8 }
 0x211   : > { %1565 = vrot.lane.b32.xlu0 %v4560_v53, %s2658_s8 }
 0x212   : > { %v1314_v5 = vpop.permute.xlu1 %1313 }
 0x213   : > { %1393 = vst.msk [vmem:[#allocation2 + $0x44] sm:$0xf] %vm1375_vm7, %v1314_v5  ;;  %v1312_v17 = vpop.permute.xlu0 %1311  ;;  %1577 = vrot.lane.b32.xlu2 %v4566_v28, %s2658_s8  ;;  %v1950_v28 = vunpack.c.l.b16 %v1860_v20 }
 0x214   : > { %1392 = vst.msk [vmem:[#allocation2 + $0x40] sm:$0xf] %vm1375_vm7, %v1312_v17  ;;  %v4606_v17 = vld [vmem:[#allocation27_spill] sm:$0xff] }
 0x215   : > { %v1334_v33 = vpop.permute.xlu2 %1333 }
 0x216   : > { %1403 = vst.msk [vmem:[#allocation2 + $0x6c] sm:$0xf] %vm1375_vm7, %v1334_v33 }
 0x218   : > { %1705 = vrot.lane.b32.xlu1 %v4584_v52, %s2659_s9  ;;  %v1953_v52 = vpack.c.b16 %v1950_v28, %v1950_v28 }
 0x219   : > { %1703 = vrot.lane.b32.xlu0 %v3173_v9, %s2659_s9 }
 0x21a   : > { %v1320_v14 = vpop.permute.xlu1 %1319  ;;  %v2007_v19 = vsel %vm2005_vm9, %v1953_v52, 0 }
 0x21b   : > { %1396 = vst.msk [vmem:[#allocation2 + $0x50] sm:$0xf] %vm1375_vm7, %v1320_v14  ;;  %v1318_v53 = vpop.permute.xlu0 %1317  ;;  %1715 = vrot.lane.b32.xlu2 %v3250_v4, %s2659_s9  ;;  %2014 = vmatpush.bf16.msra.mxu0 %v2007_v19  ;;  %v2530_v4 = vld [vmem:[%s4404_s1 + $0x8] sm:$0xff] }
 0x21c   : > { %1395 = vst.msk [vmem:[#allocation2 + $0x4c] sm:$0xf] %vm1375_vm7, %v1318_v53  ;;  %2531 = vmatpush.bf16.msra.mxu1 %v2007_v19  ;;  %2532 = vmatpush.bf16.msra.mxu2 %v2007_v19 }
 0x21d   : > { %v1415_v9 = vpop.permute.xlu2 %1414  ;;  %2533 = vmatpush.bf16.msra.mxu3 %v2007_v19 }
 0x21e   : > { %1510 = vst.msk [vmem:[#allocation2 + $0x4] sm:$0xf] %vm1508_vm8, %v1415_v9 }
 0x21f   : > { %2015 = vmatpush.bf16.msra.mxu0 %v2530_v4 }
 0x220   : > { %1448 = vrot.lane.b32.xlu1 %v3362_v54, %s2657_s7  ;;  %2534 = vmatpush.bf16.msra.mxu1 %v2530_v4 }
 0x221   : > { %1717 = vrot.lane.b32.xlu0 %v4587_v48, %s2659_s9  ;;  %2535 = vmatpush.bf16.msra.mxu2 %v2530_v4  ;;  %v2529_v48 = vld [vmem:[%s4404_s1] sm:$0xff] }
 0x222   : > { %v1326_v15 = vpop.permute.xlu1 %1325  ;;  %2536 = vmatpush.bf16.msra.mxu3 %v2530_v4  ;;  %v4611_v4 = vld [vmem:[#allocation6_spill] sm:$0xff] }
 0x223   : > { %1399 = vst.msk [vmem:[#allocation2 + $0x5c] sm:$0xf] %vm1375_vm7, %v1326_v15  ;;  %v1324_v2 = vpop.permute.xlu0 %1323  ;;  %1450 = vrot.lane.b32.xlu2 %v3355_v23, %s2657_s7  ;;  %2016 = vmatpush.bf16.msra.mxu0 %v2529_v48  ;;  %v4609_v15 = vld [vmem:[#allocation42_spill] sm:$0xff] }
 0x224   : > { %1398 = vst.msk [vmem:[#allocation2 + $0x58] sm:$0xf] %vm1375_vm7, %v1324_v2  ;;  %2537 = vmatpush.bf16.msra.mxu1 %v2529_v48 }
 0x225   : > { %v1696_v54 = vpop.permute.xlu2 %1695  ;;  %2538 = vmatpush.bf16.msra.mxu2 %v2529_v48 }
 0x226   : > { %2539 = vmatpush.bf16.msra.mxu3 %v2529_v48  ;;  %v4612_v48 = vld [vmem:[#allocation21_spill] sm:$0xff] }
 0x228   : > { %1462 = vrot.lane.b32.xlu1 %v3436_v51, %s2657_s7 }
 0x229   : > { %1460 = vrot.lane.b32.xlu0 %v3443_v36, %s2657_s7 }
 0x22a   : > { %v1332_v11 = vpop.permute.xlu1 %1331 }
 0x22b   : > { %1402 = vst.msk [vmem:[#allocation2 + $0x68] sm:$0xf] %vm1375_vm7, %v1332_v11  ;;  %v1330_v23 = vpop.permute.xlu0 %1329  ;;  %1591 = vrot.lane.b32.xlu2 %v4574_v10, %s2658_s8 }
 0x22c   : > { %1401 = vst.msk [vmem:[#allocation2 + $0x64] sm:$0xf] %vm1375_vm7, %v1330_v23  ;;  %v4613_v23 = vld [vmem:[#allocation22_spill] sm:$0xff] }
 0x22d   : > { %v1419_v51 = vpop.permute.xlu2 %1418 }
 0x22e   : > { %1512 = vst.msk [vmem:[#allocation2 + $0xc] sm:$0xf] %vm1508_vm8, %v1419_v51  ;;  %v4614_v51 = vld [vmem:[#allocation56_spill] sm:$0xff] }
 0x230   : > { %1603 = vrot.lane.b32.xlu1 %v4580_v60, %s2658_s8 }
 0x231   : > { %1593 = vrot.lane.b32.xlu0 %v4576_v62, %s2658_s8 }
 0x232   : > { %v1413_v36 = vpop.permute.xlu1 %1412 }
 0x233   : > { %1509 = vst.msk [vmem:[#allocation2] sm:$0xf] %vm1508_vm8, %v1413_v36  ;;  %v1336_v34 = vpop.permute.xlu0 %1335  ;;  %1605 = vrot.lane.b32.xlu2 %v3072_v58, %s2658_s8  ;;  %v1268_v36 = vrot.slane %v4614_v51, 2 }
 0x234   : > { %1404 = vst.msk [vmem:[#allocation2 + $0x70] sm:$0xf] %vm1375_vm7, %v1336_v34 }
 0x235   : > { %v1560_v10 = vpop.permute.xlu2 %1559 }
 0x238   : > { %1733 = vrot.lane.b32.xlu1 %v4591_v47, %s2659_s9 }
 0x239   : > { %1731 = vrot.lane.b32.xlu0 %v4589_v41, %s2659_s9 }
 0x23a   : > { %v1558_v62 = vpop.permute.xlu1 %1557 }
 0x23b   : > { %1653 = vst.msk [vmem:[#allocation2 + $0x4] sm:$0xf] %vm1651_vm10, %v1558_v62  ;;  %v1556_v60 = vpop.permute.xlu0 %1555  ;;  %1743 = vrot.lane.b32.xlu2 %v3454_v37, %s2659_s9  ;;  %v4594_v37 = vld [vmem:[#allocation37_spill] sm:$0xff] }
 0x23c   : > { %1652 = vst.msk [vmem:[#allocation2] sm:$0xf] %vm1651_vm10, %v1556_v60 }
 0x23d   : > { %1792 = vst.msk [vmem:[#allocation2] sm:$0xf] %vm1791_vm11, %v1696_v54  ;;  %v1574_v58 = vpop.permute.xlu2 %1573  ;;  %v1271_v54 = vrot.slane %v4611_v4, 2 }
 0x240   : > { %1424 = vrot.lane.b32.xlu1 %v3199_v50, %s2657_s7  ;;  %v4595_v50 = vld [vmem:[#allocation39_spill] sm:$0xff] }
 0x241   : > { %1745 = vrot.lane.b32.xlu0 %v4592_v57, %s2659_s9 }
 0x242   : > { %v1417_v41 = vpop.permute.xlu1 %1416 }
 0x243   : > { %1511 = vst.msk [vmem:[#allocation2 + $0x8] sm:$0xf] %vm1508_vm8, %v1417_v41  ;;  %v1698_v47 = vpop.permute.xlu0 %1697  ;;  %1426 = vrot.lane.b32.xlu2 %v4593_v56, %s2657_s7  ;;  %v4615_v41 = vld [vmem:[#allocation44_spill] sm:$0xff] }
 0x244   : > { %1793 = vst.msk [vmem:[#allocation2 + $0x4] sm:$0xf] %vm1791_vm11, %v1698_v47 }
 0x245   : > { %1654 = vst.msk [vmem:[#allocation2 + $0x8] sm:$0xf] %vm1651_vm10, %v1560_v10  ;;  %v1712_v45 = vpop.permute.xlu2 %1711 }
 0x248   : > { %1438 = vrot.lane.b32.xlu1 %v4594_v37, %s2657_s7 }
 0x249   : > { %1436 = vrot.lane.b32.xlu0 %v4595_v50, %s2657_s7 }
 0x24a   : > { %v1431_v1 = vpop.permute.xlu1 %1430 }
 0x24b   : > { %1518 = vst.msk [vmem:[#allocation2 + $0x24] sm:$0xf] %vm1508_vm8, %v1431_v1  ;;  %v1429_v57 = vpop.permute.xlu0 %1428  ;;  %v2513_v29 = vld [vmem:[#allocation2] sm:$0xff]  ;;  %1567 = vrot.lane.b32.xlu2 %v4596_v7, %s2658_s8  ;;  %v4618_v1 = vld [vmem:[#allocation51_spill] sm:$0xff] }
 0x24c   : > { %1517 = vst.msk [vmem:[#allocation2 + $0x20] sm:$0xf] %vm1508_vm8, %v1429_v57  ;;  %2492 = vmatmul.msk.bf16.vlgmr.msra.gmra.mxu0 %vm1956_vm12, %v2513_v29 }
 0x24d   : > { %1661 = vst.msk [vmem:[#allocation2 + $0x24] sm:$0xf] %vm1651_vm10, %v1574_v58  ;;  %v1447_v30 = vpop.permute.xlu2 %1446 }
 0x24e   : > { %1526 = vst.msk [vmem:[#allocation2 + $0x44] sm:$0xf] %vm1508_vm8, %v1447_v30  ;;  %v4620_v30 = vld [vmem:[#allocation31_spill] sm:$0xff] }
 0x250   : > { %1579 = vrot.lane.b32.xlu1 %v4597_v0, %s2658_s8  ;;  %v4619_v0 = vld [vmem:[#allocation59_spill] sm:$0xff] }
 0x251   : > { %1569 = vrot.lane.b32.xlu0 %v4598_v42, %s2658_s8 }
 0x252   : > { %v1572_v27 = vpop.permute.xlu1 %1571 }
 0x253   : > { %1660 = vst.msk [vmem:[#allocation2 + $0x20] sm:$0xf] %vm1651_vm10, %v1572_v27  ;;  %v1562_v26 = vpop.permute.xlu0 %1561  ;;  %1581 = vrot.lane.b32.xlu2 %v4599_v18, %s2658_s8  ;;  %v4621_v27 = vld [vmem:[#allocation29_spill] sm:$0xff] }
 0x254   : > { %1655 = vst.msk [vmem:[#allocation2 + $0xc] sm:$0xf] %vm1651_vm10, %v1562_v26 }
 0x255   : > { %1800 = vst.msk [vmem:[#allocation2 + $0x20] sm:$0xf] %vm1791_vm11, %v1712_v45  ;;  %v1728_v63 = vpop.permute.xlu2 %1727  ;;  %v4617_v45 = vld [vmem:[#allocation57_spill] sm:$0xff] }
 0x258   : > { %1709 = vrot.lane.b32.xlu1 %v4585_v8, %s2659_s9 }
 0x259   : > { %1707 = vrot.lane.b32.xlu0 %v3215_v38, %s2659_s9 }
 0x25a   : > { %v1702_v12 = vpop.permute.xlu1 %1701 }
 0x25b   : > { %1795 = vst.msk [vmem:[#allocation2 + $0xc] sm:$0xf] %vm1791_vm11, %v1702_v12  ;;  %v1700_v25 = vpop.permute.xlu0 %1699  ;;  %1719 = vrot.lane.b32.xlu2 %v4586_v31, %s2659_s9  ;;  %v4601_v31 = vld [vmem:[#allocation49_spill] sm:$0xff] }
 0x25c   : > { %1794 = vst.msk [vmem:[#allocation2 + $0x8] sm:$0xf] %vm1791_vm11, %v1700_v25  ;;  %v4623_v25 = vld [vmem:[#allocation7_spill] sm:$0xff] }
 0x25d   : > { %v1423_v35 = vpop.permute.xlu2 %1422 }
 0x25e   : > { %1514 = vst.msk [vmem:[#allocation2 + $0x14] sm:$0xf] %vm1508_vm8, %v1423_v35 }
 0x260   : > { %1452 = vrot.lane.b32.xlu1 %v4600_v44, %s2657_s7 }
 0x261   : > { %1721 = vrot.lane.b32.xlu0 %v4588_v59, %s2659_s9  ;;  %v4603_v59 = vld [vmem:[#allocation54_spill] sm:$0xff] }
 0x262   : > { %v1445_v8 = vpop.permute.xlu1 %1444 }
 0x263   : > { %1525 = vst.msk [vmem:[#allocation2 + $0x40] sm:$0xf] %vm1508_vm8, %v1445_v8  ;;  %v1714_v38 = vpop.permute.xlu0 %1713  ;;  %v2514_v40 = vld [vmem:[#allocation2 + $0x8] sm:$0xff]  ;;  %1454 = vrot.lane.b32.xlu2 %v4601_v31, %s2657_s7 }
 0x264   : > { %1801 = vst.msk [vmem:[#allocation2 + $0x24] sm:$0xf] %vm1791_vm11, %v1714_v38  ;;  %2493 = vmatmul.msk.bf16.gmra.mxu0 %vm1956_vm12, %v2514_v40  ;;  %v236_v31 = vld [vmem:[%s2736_s28 + $0x1a8] sm:$0x3] }
 0x265   : > { %v1564_v49 = vpop.permute.xlu2 %1563 }
 0x268   : > { %1466 = vrot.lane.b32.xlu1 %v4602_v22, %s2657_s7 }
 0x269   : > { %1464 = vrot.lane.b32.xlu0 %v4603_v59, %s2657_s7  ;;  %v234_v59 = vld [vmem:[%s2736_s28 + $0x198] sm:$0xff] }
 0x26a   : > { %v1590_v6 = vpop.permute.xlu1 %1589 }
 0x26b   : > { %1669 = vst.msk [vmem:[#allocation2 + $0x44] sm:$0xf] %vm1651_vm10, %v1590_v6  ;;  %v1588_v61 = vpop.permute.xlu0 %1587  ;;  %v2517_v24 = vld [vmem:[#allocation2 + $0x20] sm:$0xff]  ;;  %1595 = vrot.lane.b32.xlu2 %v4604_v32, %s2658_s8 }
 0x26c   : > { %1668 = vst.msk [vmem:[#allocation2 + $0x40] sm:$0xf] %vm1651_vm10, %v1588_v61  ;;  %2496 = vmatmul.msk.bf16.vlgmr.msra.gmra.mxu1 %vm1956_vm12, %v2517_v24  ;;  %v235_v6 = vld [vmem:[%s2736_s28 + $0x1a0] sm:$0xff]  ;;  %v1408_v61 = vpack.c.bf16 %v234_v59, %v234_v59  ;;  %v1544_v24 = vrot.slane %v234_v59, 1 }
 0x26d   : > { %1808 = vst.msk [vmem:[#allocation2 + $0x40] sm:$0xf] %vm1791_vm11, %v1728_v63  ;;  %v1578_v5 = vpop.permute.xlu2 %1577  ;;  %v4622_v63 = vld [vmem:[#allocation10_spill] sm:$0xff]  ;;  %v1545_v32 = vrot.slane %v235_v6, 1 }
 0x270   : > { %1607 = vrot.lane.b32.xlu1 %v4605_v21, %s2658_s8 }
 0x271   : > { %1597 = vrot.lane.b32.xlu0 %v4606_v17, %s2658_s8 }
 0x272   : > { %v1421_v33 = vpop.permute.xlu1 %1420 }
 0x273   : > { %1513 = vst.msk [vmem:[#allocation2 + $0x10] sm:$0xf] %vm1508_vm8, %v1421_v33  ;;  %v1730_v14 = vpop.permute.xlu0 %1729  ;;  %1609 = vrot.lane.b32.xlu2 %v4583_v13, %s2658_s8  ;;  %v4607_v13 = vld [vmem:[#allocation43_spill] sm:$0xff]  ;;  %v1546_v33 = vsel %vm350_vm0, %v1544_v24, %v1545_v32 }
 0x274   : > { %1809 = vst.msk [vmem:[#allocation2 + $0x44] sm:$0xf] %vm1791_vm11, %v1730_v14  ;;  %v1409_v14 = vpack.c.bf16 %v235_v6, %v235_v6 }
 0x275   : > { %1656 = vst.msk [vmem:[#allocation2 + $0x10] sm:$0xf] %vm1651_vm10, %v1564_v49  ;;  %v1716_v53 = vpop.permute.xlu2 %1715 }
 0x278   : > { %1737 = vrot.lane.b32.xlu1 %v3414_v46, %s2659_s9 }
 0x279   : > { %1735 = vrot.lane.b32.xlu0 %v3399_v39, %s2659_s9  ;;  %v4608_v39 = vld [vmem:[#allocation55_spill] sm:$0xff] }
 0x27a   : > { %v1435_v20 = vpop.permute.xlu1 %1434 }
 0x27b   : > { %1520 = vst.msk [vmem:[#allocation2 + $0x2c] sm:$0xf] %vm1508_vm8, %v1435_v20  ;;  %v1433_v28 = vpop.permute.xlu0 %1432  ;;  %v2521_v52 = vld [vmem:[#allocation2 + $0x40] sm:$0xff]  ;;  %1747 = vrot.lane.b32.xlu2 %v3477_v3, %s2659_s9 }
 0x27c   : > { %1519 = vst.msk [vmem:[#allocation2 + $0x28] sm:$0xf] %vm1508_vm8, %v1433_v28  ;;  %2500 = vmatmul.msk.bf16.vlgmr.msra.gmra.mxu2 %vm1956_vm12, %v2521_v52  ;;  %v4610_v3 = vld [vmem:[#allocation58_spill] sm:$0xff]  ;;  %v1684_v28 = vrot.slane %v234_v59, 2 }
 0x27d   : > { %1663 = vst.msk [vmem:[#allocation2 + $0x2c] sm:$0xf] %vm1651_vm10, %v1578_v5  ;;  %v1451_v46 = vpop.permute.xlu2 %1450  ;;  %v1269_v2 = vrot.slane %v4610_v3, 2 }
 0x27e   : > { %1528 = vst.msk [vmem:[#allocation2 + $0x4c] sm:$0xf] %vm1508_vm8, %v1451_v46  ;;  %v1685_v46 = vrot.slane %v235_v6, 2 }
 0x27f   : > { %v1272_v62 = vsel %vm656_vm1, %v1269_v2, %v1271_v54  ;;  %v1270_v60 = vsel %vm656_vm1, %v1268_v36, %v1269_v2 }
 0x280   : > { %1440 = vrot.lane.b32.xlu1 %v4607_v13, %s2657_s7  ;;  %v1276_v8 = vpack.c.bf16 %v1272_v62, %v1272_v62  ;;  %v1275_v38 = vpack.c.bf16 %v1270_v60, %v1270_v60  ;;  %v1551_v13 = vpack.c.bf16 %v1546_v33, %v1546_v33 }
 0x281   : > { %1749 = vrot.lane.b32.xlu0 %v4608_v39, %s2659_s9 }
 0x282   : > { %v1576_v9 = vpop.permute.xlu1 %1575 }
 0x283   : > { %1662 = vst.msk [vmem:[#allocation2 + $0x28] sm:$0xf] %vm1651_vm10, %v1576_v9  ;;  %v1566_v19 = vpop.permute.xlu0 %1565  ;;  %1442 = vrot.lane.b32.xlu2 %v4609_v15, %s2657_s7  ;;  %v1686_v9 = vsel %vm656_vm1, %v1684_v28, %v1685_v46 }
 0x284   : > { %1657 = vst.msk [vmem:[#allocation2 + $0x14] sm:$0xf] %vm1651_vm10, %v1566_v19  ;;  %v1691_v2 = vpack.c.bf16 %v1686_v9, %v1686_v9 }
 0x285   : > { %1802 = vst.msk [vmem:[#allocation2 + $0x28] sm:$0xf] %vm1791_vm11, %v1716_v53  ;;  %v1592_v11 = vpop.permute.xlu2 %1591 }
 0x288   : > { %1585 = vrot.lane.b32.xlu1 %v4612_v48, %s2658_s8 }
 0x289   : > { %1583 = vrot.lane.b32.xlu0 %v4613_v23, %s2658_s8 }
 0x28a   : > { %v1706_v34 = vpop.permute.xlu1 %1705 }
 0x28b   : > { %1797 = vst.msk [vmem:[#allocation2 + $0x14] sm:$0xf] %vm1791_vm11, %v1706_v34  ;;  %v1704_v10 = vpop.permute.xlu0 %1703  ;;  %1723 = vrot.lane.b32.xlu2 %v3318_v55, %s2659_s9  ;;  %v4616_v55 = vld [vmem:[#allocation48_spill] sm:$0xff] }
 0x28c   : > { %1796 = vst.msk [vmem:[#allocation2 + $0x10] sm:$0xf] %vm1791_vm11, %v1704_v10 }
 0x28d   : > { %v1606_v58 = vpop.permute.xlu2 %1605 }
 0x290   : > { %1337 = vrot.lane.b32.xlu1 %v4608_v39, %s2656_s6  ;;  %v1687_v39 = vrot.slane %v236_v31, 2 }
 0x291   : > { %1725 = vrot.lane.b32.xlu0 %v4615_v41, %s2659_s9 }
 0x292   : > { %v1449_v47 = vpop.permute.xlu1 %1448  ;;  %v1688_v3 = vsel %vm656_vm1, %v1685_v46, %v1687_v39 }
 0x293   : > { %1527 = vst.msk [vmem:[#allocation2 + $0x48] sm:$0xf] %vm1508_vm8, %v1449_v47  ;;  %v1718_v56 = vpop.permute.xlu0 %1717  ;;  %v2515_v37 = vld [vmem:[#allocation2 + $0x10] sm:$0xff]  ;;  %1456 = vrot.lane.b32.xlu2 %v4616_v55, %s2657_s7  ;;  %v1692_v54 = vpack.c.bf16 %v1688_v3, %v1688_v3 }
 0x294   : > { %1803 = vst.msk [vmem:[#allocation2 + $0x2c] sm:$0xf] %vm1791_vm11, %v1718_v56  ;;  %2494 = vmatmul.msk.bf16.gmra.mxu0 %vm1956_vm12, %v2515_v37 }
 0x295   : > { %1670 = vst.msk [vmem:[#allocation2 + $0x48] sm:$0xf] %vm1651_vm10, %v1592_v11  ;;  %v1744_v50 = vpop.permute.xlu2 %1743 }
 0x298   : > { %1468 = vrot.lane.b32.xlu1 %v4617_v45, %s2657_s7 }
 0x299   : > { %1458 = vrot.lane.b32.xlu0 %v4618_v1, %s2657_s7 }
 0x29a   : > { %v1463_v57 = vpop.permute.xlu1 %1462 }
 0x29b   : > { %1534 = vst.msk [vmem:[#allocation2 + $0x64] sm:$0xf] %vm1508_vm8, %v1463_v57  ;;  %v1461_v29 = vpop.permute.xlu0 %1460  ;;  %v2518_v7 = vld [vmem:[#allocation2 + $0x28] sm:$0xff]  ;;  %1470 = vrot.lane.b32.xlu2 %v4619_v0, %s2657_s7 }
 0x29c   : > { %1533 = vst.msk [vmem:[#allocation2 + $0x60] sm:$0xf] %vm1508_vm8, %v1461_v29  ;;  %2497 = vmatmul.msk.bf16.gmra.mxu1 %vm1956_vm12, %v2518_v7 }
 0x29d   : > { %1677 = vst.msk [vmem:[#allocation2 + $0x64] sm:$0xf] %vm1651_vm10, %v1606_v58  ;;  %v1427_v42 = vpop.permute.xlu2 %1426 }
 0x29e   : > { %1516 = vst.msk [vmem:[#allocation2 + $0x1c] sm:$0xf] %vm1508_vm8, %v1427_v42 }
 0x2a0   : > { %1601 = vrot.lane.b32.xlu1 %v4620_v30, %s2658_s8 }
 0x2a1   : > { %1599 = vrot.lane.b32.xlu0 %v4621_v27, %s2658_s8 }
 0x2a2   : > { %v1604_v26 = vpop.permute.xlu1 %1603 }
 0x2a3   : > { %1676 = vst.msk [vmem:[#allocation2 + $0x60] sm:$0xf] %vm1651_vm10, %v1604_v26  ;;  %v1594_v18 = vpop.permute.xlu0 %1593  ;;  %1611 = vrot.lane.b32.xlu2 %v4622_v63, %s2658_s8 }
 0x2a4   : > { %1671 = vst.msk [vmem:[#allocation2 + $0x4c] sm:$0xf] %vm1651_vm10, %v1594_v18 }
 0x2a5   : > { %1816 = vst.msk [vmem:[#allocation2 + $0x60] sm:$0xf] %vm1791_vm11, %v1744_v50  ;;  %v1568_v12 = vpop.permute.xlu2 %1567 }
 0x2a8   : > { %1739 = vrot.lane.b32.xlu1 %v3412_v43, %s2659_s9 }
 0x2a9   : > { %1613 = vrot.lane.b32.xlu0 %v4623_v25, %s2658_s8 }
 0x2aa   : > { %v1734_v44 = vpop.permute.xlu1 %1733 }
 0x2ab   : > { %1811 = vst.msk [vmem:[#allocation2 + $0x4c] sm:$0xf] %vm1791_vm11, %v1734_v44  ;;  %v1732_v35 = vpop.permute.xlu0 %1731  ;;  %1741 = vrot.lane.b32.xlu2 %v3439_v16, %s2659_s9  ;;  %v1547_v16 = vrot.slane %v236_v31, 1 }
 0x2ac   : > { %1810 = vst.msk [vmem:[#allocation2 + $0x48] sm:$0xf] %vm1791_vm11, %v1732_v35 }
 0x2ad   : > { %v1582_v43 = vpop.permute.xlu2 %1581  ;;  %v1548_v5 = vsel %vm350_vm0, %v1545_v32, %v1547_v16 }
 0x2ae   : > { %v1552_v52 = vpack.c.bf16 %v1548_v5, %v1548_v5 }
 0x2b0   : > { %1753 = vrot.lane.b32.xlu1 %v1276_v8, %s2659_s9 }
 0x2b1   : > { %1751 = vrot.lane.b32.xlu0 %v1275_v38, %s2659_s9 }
 0x2b2   : > { %v1425_v40 = vpop.permute.xlu1 %1424 }
 0x2b3   : > { %1515 = vst.msk [vmem:[#allocation2 + $0x18] sm:$0xf] %vm1508_vm8, %v1425_v40  ;;  %v1746_v22 = vpop.permute.xlu0 %1745  ;;  %v2522_v49 = vld [vmem:[#allocation2 + $0x48] sm:$0xff]  ;;  %1339 = vrot.lane.b32.xlu2 %v1275_v38, %s2656_s6 }
 0x2b4   : > { %1817 = vst.msk [vmem:[#allocation2 + $0x64] sm:$0xf] %vm1791_vm11, %v1746_v22  ;;  %2501 = vmatmul.msk.bf16.gmra.mxu2 %vm1956_vm12, %v2522_v49 }
 0x2b5   : > { %1658 = vst.msk [vmem:[#allocation2 + $0x18] sm:$0xf] %vm1651_vm10, %v1568_v12  ;;  %v1720_v21 = vpop.permute.xlu2 %1719 }
 0x2b8   : > { %1472 = vrot.lane.b32.xlu1 %v1408_v61, %s2657_s7 }
 0x2b9   : > { %1341 = vrot.lane.b32.xlu0 %v1276_v8, %s2656_s6 }
 0x2ba   : > { %v1439_v17 = vpop.permute.xlu1 %1438 }
 0x2bb   : > { %1522 = vst.msk [vmem:[#allocation2 + $0x34] sm:$0xf] %vm1508_vm8, %v1439_v17  ;;  %v1437_v53 = vpop.permute.xlu0 %1436  ;;  %v2525_v20 = vld [vmem:[#allocation2 + $0x60] sm:$0xff]  ;;  %1474 = vrot.lane.b32.xlu2 %v1409_v14, %s2657_s7  ;;  %s2323_s7 = scalar_lea.hbm %s4406_s3, %s2509_s4 }
 0x2bc   : > { %1521 = vst.msk [vmem:[#allocation2 + $0x30] sm:$0xf] %vm1508_vm8, %v1437_v53  ;;  %2504 = vmatmul.msk.bf16.vlgmr.msra.gmra.mxu3 %vm1956_vm12, %v2525_v20  ;;  %s2327_s10 = sshll.u32 %s2323_s7, 4  ;;  %s2328_s10 = int_to_ptr.hbm [resolvable:$true] %s2327_s10 }
 0x2bd   : > { %1665 = vst.msk [vmem:[#allocation2 + $0x34] sm:$0xf] %vm1651_vm10, %v1582_v43  ;;  %v1455_v19 = vpop.permute.xlu2 %1454  ;;  %s2602_s11 = sshra.s32 %s2328_s10, 4  ;;  %s2603_s11 = int_to_ptr.hbm [resolvable:$true] %s2602_s11 }
 0x2be   : > { %1530 = vst.msk [vmem:[#allocation2 + $0x54] sm:$0xf] %vm1508_vm8, %v1455_v19  ;;  %s2604_s17 = scalar_lea.hbm %s2603_s11, 2  ;;  %p2609_p0 = scmp.lt.s32.totalorder %s2603_s11, %s4406_s3 }
 0x2bf   : > { %p2605_p11 = scmp.ne.s32.totalorder %s2603_s11, %s2604_s17  ;;  %p2610_p1 = scmp.lt.s32.totalorder %s2608_s25, %s2604_s17 }
 0x2c0   : > { %1617 = vrot.lane.b32.xlu1 %v1552_v52, %s2658_s8 }
 0x2c1   : > { %1615 = vrot.lane.b32.xlu0 %v1551_v13, %s2658_s8  ;;  %s171_s8 = scalar_lea.vmem [#allocation3], %s2416_s30  ;;  %p2606_p12 = pnand %p2605_p11, %p2718_p5 }
 0x2c2   : > { %v1580_v15 = vpop.permute.xlu1 %1579  ;;  %p2611_p2 = por %p2610_p1, %p2609_p0 }
 0x2c3   : > { %1664 = vst.msk [vmem:[#allocation2 + $0x30] sm:$0xf] %vm1651_vm10, %v1580_v15  ;;  %v1570_v4 = vpop.permute.xlu0 %1569  ;;  %1755 = vrot.lane.b32.xlu2 %v1691_v2, %s2659_s9  ;;  %p2607_p13 = pneg %p2606_p12 }
 0x2c4   : > { %1659 = vst.msk [vmem:[#allocation2 + $0x1c] sm:$0xf] %vm1651_vm10, %v1570_v4 }
 0x2c5   : > { %1804 = vst.msk [vmem:[#allocation2 + $0x30] sm:$0xf] %vm1791_vm11, %v1720_v21  ;;  %v1596_v48 = vpop.permute.xlu2 %1595  ;;  %p2612_p3 = pnand %p2611_p2, %p2607_p13 }
 0x2c9   : > { %1757 = vrot.lane.b32.xlu0 %v1692_v54, %s2659_s9  ;;  %v2018_v23 = vpop.f32.mrf.mxu0  ;;  %s2325_s9 = sshll.u32 %s171_s8, 4  ;;  %s2326_s9 = int_to_ptr.vmem [resolvable:$true] %s2325_s9 }
 0x2ca   : > { %v1710_v11 = vpop.permute.xlu1 %1709  ;;  %2099 = vst.msk [vmem:[%s4120_s29] sm:$0xff] %vm2098_vm13, %v2018_v23  ;;  %v2202_v34 = vmul.f32 %v2018_v23, %v2018_v23  ;;  %v2131_v60 = vsel %vm2098_vm13, %v2018_v23, 0.0 }
 0x2cb   : > { %1799 = vst.msk [vmem:[#allocation2 + $0x1c] sm:$0xf] %vm1791_vm11, %v1710_v11  ;;  %v1708_v51 = vpop.permute.xlu0 %1707 }
 0x2cc   : > { %1798 = vst.msk [vmem:[#allocation2 + $0x18] sm:$0xf] %vm1791_vm11, %v1708_v51  ;;  %v2234_v55 = vsel %vm2098_vm13, %v2202_v34, 0.0 }
 0x2cd   : > { %v1610_v36 = vpop.permute.xlu2 %1609 }
 0x2d1   : > { %v2020_v62 = vpop.f32.mrf.mxu0 }
 0x2d2   : > { %v1453_v10 = vpop.permute.xlu1 %1452  ;;  %v2132_v41 = vsel %vm2098_vm13, %v2020_v62, 0.0  ;;  %v2203_v47 = vmul.f32 %v2020_v62, %v2020_v62  ;;  %2100 = vst.msk [vmem:[%s4120_s29 + $0x8] sm:$0xff] %vm2098_vm13, %v2020_v62 }
 0x2d3   : > { %1529 = vst.msk [vmem:[#allocation2 + $0x50] sm:$0xf] %vm1508_vm8, %v1453_v10  ;;  %v1722_v58 = vpop.permute.xlu0 %1721  ;;  %v2516_v56 = vld [vmem:[#allocation2 + $0x18] sm:$0xff]  ;;  %v2133_v37 = vadd.f32 %v2132_v41, %v2131_v60 }
 0x2d4   : > { %1805 = vst.msk [vmem:[#allocation2 + $0x34] sm:$0xf] %vm1791_vm11, %v1722_v58  ;;  %v2235_v45 = vsel %vm2098_vm13, %v2203_v47, 0.0  ;;  %2495 = vmatmul.msk.bf16.gmra.mxu0 %vm1956_vm12, %v2516_v56 }
 0x2d5   : > { %v2236_v50 = vadd.f32 %v2235_v45, %v2234_v55  ;;  %1672 = vst.msk [vmem:[#allocation2 + $0x50] sm:$0xf] %vm1651_vm10, %v1596_v48  ;;  %v1748_v1 = vpop.permute.xlu2 %1747 }
 0x2da   : > { %v1467_v57 = vpop.permute.xlu1 %1466 }
 0x2db   : > { %1536 = vst.msk [vmem:[#allocation2 + $0x6c] sm:$0xf] %vm1508_vm8, %v1467_v57  ;;  %v1465_v29 = vpop.permute.xlu0 %1464  ;;  %v2519_v7 = vld [vmem:[#allocation2 + $0x30] sm:$0xff] }
 0x2dc   : > { %1535 = vst.msk [vmem:[#allocation2 + $0x68] sm:$0xf] %vm1508_vm8, %v1465_v29  ;;  %2498 = vmatmul.msk.bf16.gmra.mxu1 %vm1956_vm12, %v2519_v7 }
 0x2dd   : > { %1679 = vst.msk [vmem:[#allocation2 + $0x6c] sm:$0xf] %vm1651_vm10, %v1610_v36  ;;  %v1443_v0 = vpop.permute.xlu2 %1442 }
 0x2de   : > { %1524 = vst.msk [vmem:[#allocation2 + $0x3c] sm:$0xf] %vm1508_vm8, %v1443_v0 }
 0x2e1   : > { %v2023_v42 = vpop.f32.mrf.mxu0 }
 0x2e2   : > { %v1608_v30 = vpop.permute.xlu1 %1607  ;;  %v2134_v26 = vsel %vm2098_vm13, %v2023_v42, 0.0  ;;  %v2204_v18 = vmul.f32 %v2023_v42, %v2023_v42  ;;  %2101 = vst.msk [vmem:[%s4120_s29 + $0x10] sm:$0xff] %vm2098_vm13, %v2023_v42 }
 0x2e3   : > { %1678 = vst.msk [vmem:[#allocation2 + $0x68] sm:$0xf] %vm1651_vm10, %v1608_v30  ;;  %v1598_v27 = vpop.permute.xlu0 %1597  ;;  %v2135_v63 = vadd.f32 %v2134_v26, %v2133_v37 }
 0x2e4   : > { %1673 = vst.msk [vmem:[#allocation2 + $0x54] sm:$0xf] %vm1651_vm10, %v1598_v27  ;;  %v2237_v12 = vsel %vm2098_vm13, %v2204_v18, 0.0 }
 0x2e5   : > { %v2238_v25 = vadd.f32 %v2237_v12, %v2236_v50  ;;  %1818 = vst.msk [vmem:[#allocation2 + $0x68] sm:$0xf] %vm1791_vm11, %v1748_v1  ;;  %v1724_v44 = vpop.permute.xlu2 %1723 }
 0x2e9   : > { %v4148_v8 = vpop.f32.mrf.mxu1  ;;  %v2025_v43 = vpop.f32.mrf.mxu0 }
 0x2ea   : > { %v1738_v35 = vpop.permute.xlu1 %1737  ;;  %2107 = vst.msk [vmem:[%s4120_s29 + $0x40] sm:$0xff] %vm2098_vm13, %v4148_v8  ;;  %v2136_v40 = vsel %vm2098_vm13, %v2025_v43, 0.0  ;;  %v2205_v31 = vmul.f32 %v2025_v43, %v2025_v43 }
 0x2eb   : > { %1813 = vst.msk [vmem:[#allocation2 + $0x54] sm:$0xf] %vm1791_vm11, %v1738_v35  ;;  %v1736_v38 = vpop.permute.xlu0 %1735  ;;  %v2137_v22 = vadd.f32 %v2136_v40, %v2135_v63 }
 0x2ec   : > { %1812 = vst.msk [vmem:[#allocation2 + $0x50] sm:$0xf] %vm1791_vm11, %v1736_v38  ;;  %v2239_v49 = vsel %vm2098_vm13, %v2205_v31, 0.0 }
 0x2ed   : > { %2102 = vst.msk [vmem:[%s4120_s29 + $0x18] sm:$0xff] %vm2098_vm13, %v2025_v43  ;;  %v2240_v59 = vadd.f32 %v2239_v49, %v2238_v25  ;;  %v1457_v6 = vpop.permute.xlu2 %1456  ;;  %v2210_v49 = vmul.f32 %v4148_v8, %v4148_v8 }
 0x2ee   : > { %1531 = vst.msk [vmem:[#allocation2 + $0x58] sm:$0xf] %vm1508_vm8, %v1457_v6 }
 0x2f1   : > { %v4160_v16 = vpop.f32.mrf.mxu1 }
 0x2f2   : > { %v1441_v61 = vpop.permute.xlu1 %1440  ;;  %2108 = vst.msk [vmem:[%s4120_s29 + $0x48] sm:$0xff] %vm2098_vm13, %v4160_v16 }
 0x2f3   : > { %1523 = vst.msk [vmem:[#allocation2 + $0x38] sm:$0xf] %vm1508_vm8, %v1441_v61  ;;  %v1750_v24 = vpop.permute.xlu0 %1749  ;;  %v2523_v32 = vld [vmem:[#allocation2 + $0x50] sm:$0xff] }
 0x2f4   : > { %1819 = vst.msk [vmem:[#allocation2 + $0x6c] sm:$0xf] %vm1791_vm11, %v1750_v24  ;;  %2502 = vmatmul.msk.bf16.gmra.mxu2 %vm1956_vm12, %v2523_v32  ;;  %v2146_v24 = vsel %vm2098_vm13, %v4148_v8, 0.0  ;;  %v2211_v32 = vmul.f32 %v4160_v16, %v4160_v16 }
 0x2f5   : > { %v1471_v21 = vpop.permute.xlu2 %1470 }
 0x2f6   : > { %v2251_v8 = vsel %vm2098_vm13, %v2211_v32, 0.0 }
 0x2fa   : > { %v1586_v5 = vpop.permute.xlu1 %1585 }
 0x2fb   : > { %1667 = vst.msk [vmem:[#allocation2 + $0x3c] sm:$0xf] %vm1651_vm10, %v1586_v5  ;;  %v1584_v17 = vpop.permute.xlu0 %1583  ;;  %v2526_v33 = vld [vmem:[#allocation2 + $0x68] sm:$0xff] }
 0x2fc   : > { %1666 = vst.msk [vmem:[#allocation2 + $0x38] sm:$0xf] %vm1651_vm10, %v1584_v17  ;;  %2505 = vmatmul.msk.bf16.gmra.mxu3 %vm1956_vm12, %v2526_v33  ;;  %v2249_v33 = vsel %vm2098_vm13, %v2210_v49, 0.0 }
 0x2fd   : > { %1806 = vst.msk [vmem:[#allocation2 + $0x38] sm:$0xf] %vm1791_vm11, %v1724_v44  ;;  %v1612_v53 = vpop.permute.xlu2 %1611 }
 0x2ff   : > { %v4172_v14 = vpop.f32.mrf.mxu2 }
 0x300   : > { %2115 = vst.msk [vmem:[%s4120_s29 + $0x80] sm:$0xff] %vm2098_vm13, %v4172_v14 }
 0x302   : > { %v1338_v20 = vpop.permute.xlu1 %1337 }
 0x303   : > { %1405 = vst.msk [vmem:[#allocation2 + $0x74] sm:$0xf] %vm1375_vm7, %v1338_v20  ;;  %v1726_v28 = vpop.permute.xlu0 %1725 }
 0x304   : > { %1807 = vst.msk [vmem:[#allocation2 + $0x3c] sm:$0xf] %vm1791_vm11, %v1726_v28 }
 0x305   : > { %1538 = vst.msk [vmem:[#allocation2 + $0x74] sm:$0xf] %vm1508_vm8, %v1471_v21  ;;  %v1742_v13 = vpop.permute.xlu2 %1741 }
 0x307   : > { %v4180_v52 = vpop.f32.mrf.mxu2 }
 0x308   : > { %2116 = vst.msk [vmem:[%s4120_s29 + $0x88] sm:$0xff] %vm2098_vm13, %v4180_v52 }
 0x30a   : > { %v1469_v46 = vpop.permute.xlu1 %1468 }
 0x30b   : > { %1537 = vst.msk [vmem:[#allocation2 + $0x70] sm:$0xf] %vm1508_vm8, %v1469_v46  ;;  %v1459_v39 = vpop.permute.xlu0 %1458  ;;  %v2520_v9 = vld [vmem:[#allocation2 + $0x38] sm:$0xff] }
 0x30c   : > { %1532 = vst.msk [vmem:[#allocation2 + $0x5c] sm:$0xf] %vm1508_vm8, %v1459_v39  ;;  %2499 = vmatmul.msk.bf16.gmra.mxu1 %vm1956_vm12, %v2520_v9 }
 0x30d   : > { %1680 = vst.msk [vmem:[#allocation2 + $0x70] sm:$0xf] %vm1651_vm10, %v1612_v53  ;;  %v1340_v19 = vpop.permute.xlu2 %1339  ;;  %v2148_v53 = vsel %vm2098_vm13, %v4160_v16, 0.0 }
 0x30e   : > { %1406 = vst.msk [vmem:[#allocation2 + $0x78] sm:$0xf] %vm1375_vm7, %v1340_v19 }
 0x311   : > { %v2028_v3 = vpop.f32.mrf.mxu0 }
 0x312   : > { %v1602_v15 = vpop.permute.xlu1 %1601  ;;  %v2138_v4 = vsel %vm2098_vm13, %v2028_v3, 0.0  ;;  %v2206_v54 = vmul.f32 %v2028_v3, %v2028_v3  ;;  %2103 = vst.msk [vmem:[%s4120_s29 + $0x20] sm:$0xff] %vm2098_vm13, %v2028_v3 }
 0x313   : > { %1675 = vst.msk [vmem:[#allocation2 + $0x5c] sm:$0xf] %vm1651_vm10, %v1602_v15  ;;  %v1600_v2 = vpop.permute.xlu0 %1599  ;;  %v2139_v48 = vadd.f32 %v2138_v4, %v2137_v22 }
 0x314   : > { %1674 = vst.msk [vmem:[#allocation2 + $0x58] sm:$0xf] %vm1651_vm10, %v1600_v2  ;;  %v2241_v11 = vsel %vm2098_vm13, %v2206_v54, 0.0 }
 0x315   : > { %v2242_v23 = vadd.f32 %v2241_v11, %v2240_v59  ;;  %1815 = vst.msk [vmem:[#allocation2 + $0x5c] sm:$0xf] %vm1791_vm11, %v1742_v13  ;;  %v1475_v50 = vpop.permute.xlu2 %1474 }
 0x319   : > { %v4197_v36 = vpop.f32.mrf.mxu1  ;;  %v2030_v10 = vpop.f32.mrf.mxu0 }
 0x31a   : > { %v1740_v51 = vpop.permute.xlu1 %1739  ;;  %2109 = vst.msk [vmem:[%s4120_s29 + $0x50] sm:$0xff] %vm2098_vm13, %v4197_v36  ;;  %v2140_v62 = vsel %vm2098_vm13, %v2030_v10, 0.0  ;;  %v2207_v60 = vmul.f32 %v2030_v10, %v2030_v10  ;;  %v2212_v20 = vmul.f32 %v4197_v36, %v4197_v36  ;;  %v2150_v46 = vsel %vm2098_vm13, %v4197_v36, 0.0 }
 0x31b   : > { %1814 = vst.msk [vmem:[#allocation2 + $0x58] sm:$0xf] %vm1791_vm11, %v1740_v51  ;;  %v1614_v34 = vpop.permute.xlu0 %1613  ;;  %v2141_v58 = vadd.f32 %v2140_v62, %v2139_v48 }
 0x31c   : > { %1681 = vst.msk [vmem:[#allocation2 + $0x74] sm:$0xf] %vm1651_vm10, %v1614_v34  ;;  %v2243_v41 = vsel %vm2098_vm13, %v2207_v60, 0.0  ;;  %v2253_v3 = vsel %vm2098_vm13, %v2212_v20, 0.0 }
 0x31d   : > { %2104 = vst.msk [vmem:[%s4120_s29 + $0x28] sm:$0xff] %vm2098_vm13, %v2030_v10  ;;  %v2244_v47 = vadd.f32 %v2243_v41, %v2242_v23  ;;  %v1756_v0 = vpop.permute.xlu2 %1755 }
 0x321   : > { %v4208_v37 = vpop.f32.mrf.mxu1 }
 0x322   : > { %v1754_v56 = vpop.permute.xlu1 %1753  ;;  %v2524_v55 = vld [vmem:[#allocation2 + $0x58] sm:$0xff]  ;;  %2110 = vst.msk [vmem:[%s4120_s29 + $0x58] sm:$0xff] %vm2098_vm13, %v4208_v37  ;;  %v2213_v39 = vmul.f32 %v4208_v37, %v4208_v37  ;;  %v2152_v16 = vsel %vm2098_vm13, %v4208_v37, 0.0 }
 0x323   : > { %1821 = vst.msk [vmem:[#allocation2 + $0x74] sm:$0xf] %vm1791_vm11, %v1754_v56  ;;  %v1752_v45 = vpop.permute.xlu0 %1751  ;;  %2503 = vmatmul.msk.bf16.gmra.mxu2 %vm1956_vm12, %v2524_v55 }
 0x324   : > { %1820 = vst.msk [vmem:[#allocation2 + $0x70] sm:$0xf] %vm1791_vm11, %v1752_v45  ;;  %v2255_v48 = vsel %vm2098_vm13, %v2213_v39, 0.0 }
 0x32a   : > { %v1473_v1 = vpop.permute.xlu1 %1472 }
 0x32b   : > { %v1342_v57 = vpop.permute.xlu0 %1341  ;;  %1539 = vst.msk [vmem:[#allocation2 + $0x78] sm:$0xf] %vm1508_vm8, %v1473_v1  ;;  %v2527_v29 = vld [vmem:[#allocation2 + $0x70] sm:$0xff] }
 0x32c   : > { %1407 = vst.msk [vmem:[#allocation2 + $0x7c] sm:$0xf] %vm1375_vm7, %v1342_v57  ;;  %2506 = vmatmul.msk.bf16.gmra.mxu3 %vm1956_vm12, %v2527_v29 }
 0x32d   : > { %1540 = vst.msk [vmem:[#allocation2 + $0x7c] sm:$0xf] %vm1508_vm8, %v1475_v50 }
 0x332   : > { %v1618_v7 = vpop.permute.xlu1 %1617 }
 0x333   : > { %v1616_v30 = vpop.permute.xlu0 %1615  ;;  %1683 = vst.msk [vmem:[#allocation2 + $0x7c] sm:$0xf] %vm1651_vm10, %v1618_v7 }
 0x334   : > { %1682 = vst.msk [vmem:[#allocation2 + $0x78] sm:$0xf] %vm1651_vm10, %v1616_v30 }
 0x335   : > { %1822 = vst.msk [vmem:[#allocation2 + $0x78] sm:$0xf] %vm1791_vm11, %v1756_v0  ;;  %v2218_v0 = vmul.f32 %v4172_v14, %v4172_v14 }
 0x337   : > { %v4223_v42 = vpop.f32.mrf.mxu2 }
 0x338   : > { %2117 = vst.msk [vmem:[%s4120_s29 + $0x90] sm:$0xff] %vm2098_vm13, %v4223_v42  ;;  %v2220_v49 = vmul.f32 %v4223_v42, %v4223_v42 }
 0x33b   : > { %v1758_v27 = vpop.permute.xlu0 %1757 }
 0x33c   : > { %1823 = vst.msk [vmem:[#allocation2 + $0x7c] sm:$0xf] %vm1791_vm11, %v1758_v27 }
 0x33f   : > { %v4229_v26 = vpop.f32.mrf.mxu2  ;;  %v4231_v18 = vpop.f32.mrf.mxu3 }
 0x340   : > { %2118 = vst.msk [vmem:[%s4120_s29 + $0x98] sm:$0xff] %vm2098_vm13, %v4229_v26 }
 0x341   : > { %2123 = vst.msk [vmem:[%s4120_s29 + $0xc0] sm:$0xff] %vm2098_vm13, %v4231_v18 }
 0x343   : > { %v2528_v63 = vld [vmem:[#allocation2 + $0x78] sm:$0xff] }
 0x344   : > { %2507 = vmatmul.msk.bf16.gmra.mxu3 %vm1956_vm12, %v2528_v63 }
 0x347   : > { %v4240_v12 = vpop.f32.mrf.mxu3 }
 0x348   : > { %2124 = vst.msk [vmem:[%s4120_s29 + $0xc8] sm:$0xff] %vm2098_vm13, %v4240_v12 }
 0x351   : > { %v2033_v25 = vpop.f32.mrf.mxu0 }
 0x352   : > { %2105 = vst.msk [vmem:[%s4120_s29 + $0x30] sm:$0xff] %vm2098_vm13, %v2033_v25  ;;  %v2142_v44 = vsel %vm2098_vm13, %v2033_v25, 0.0  ;;  %v2208_v35 = vmul.f32 %v2033_v25, %v2033_v25 }
 0x353   : > { %v2143_v38 = vadd.f32 %v2142_v44, %v2141_v58  ;;  %v2162_v44 = vsel %vm2098_vm13, %v4172_v14, 0.0  ;;  %v2166_v14 = vsel %vm2098_vm13, %v4223_v42, 0.0 }
 0x354   : > { %v2245_v43 = vsel %vm2098_vm13, %v2208_v35, 0.0  ;;  %v2219_v35 = vmul.f32 %v4180_v52, %v4180_v52 }
 0x355   : > { %v2246_v40 = vadd.f32 %v2245_v43, %v2244_v47 }
 0x359   : > { %v2035_v31 = vpop.f32.mrf.mxu0  ;;  %v2048_v22 = vpop.f32.mrf.mxu1 }
 0x35a   : > { %2106 = vst.msk [vmem:[%s4120_s29 + $0x38] sm:$0xff] %vm2098_vm13, %v2035_v31  ;;  %v2144_v59 = vsel %vm2098_vm13, %v2035_v31, 0.0  ;;  %v2209_v6 = vmul.f32 %v2035_v31, %v2035_v31  ;;  %v2214_v2 = vmul.f32 %v2048_v22, %v2048_v22  ;;  %v2154_v11 = vsel %vm2098_vm13, %v2048_v22, 0.0 }
 0x35b   : > { %v2145_v61 = vadd.f32 %v2144_v59, %v2143_v38  ;;  %2111 = vst.msk [vmem:[%s4120_s29 + $0x60] sm:$0xff] %vm2098_vm13, %v2048_v22  ;;  %v2265_v31 = vsel %vm2098_vm13, %v2218_v0, 0.0  ;;  %v2164_v22 = vsel %vm2098_vm13, %v4180_v52, 0.0  ;;  %v2168_v52 = vsel %vm2098_vm13, %v4229_v26, 0.0 }
 0x35c   : > { %v2247_v21 = vsel %vm2098_vm13, %v2209_v6, 0.0  ;;  %v2257_v34 = vsel %vm2098_vm13, %v2214_v2, 0.0 }
 0x35d   : > { %v2147_v5 = vadd.f32 %v2146_v24, %v2145_v61  ;;  %v2248_v17 = vadd.f32 %v2247_v21, %v2246_v40  ;;  %v2267_v61 = vsel %vm2098_vm13, %v2219_v35, 0.0  ;;  %v2221_v24 = vmul.f32 %v4229_v26, %v4229_v26 }
 0x35f   : > { %v2149_v28 = vadd.f32 %v2148_v53, %v2147_v5  ;;  %v2250_v13 = vadd.f32 %v2249_v33, %v2248_v17  ;;  %v2269_v5 = vsel %vm2098_vm13, %v2220_v49, 0.0  ;;  %v2271_v20 = vsel %vm2098_vm13, %v2221_v24, 0.0 }
 0x361   : > { %v2252_v9 = vadd.f32 %v2251_v8, %v2250_v13  ;;  %v2151_v19 = vadd.f32 %v2150_v46, %v2149_v28  ;;  %v2050_v15 = vpop.f32.mrf.mxu1 }
 0x362   : > { %2112 = vst.msk [vmem:[%s4120_s29 + $0x68] sm:$0xff] %vm2098_vm13, %v2050_v15  ;;  %v2215_v23 = vmul.f32 %v2050_v15, %v2050_v15  ;;  %v2156_v10 = vsel %vm2098_vm13, %v2050_v15, 0.0 }
 0x363   : > { %v2153_v4 = vadd.f32 %v2152_v16, %v2151_v19  ;;  %v2254_v54 = vadd.f32 %v2253_v3, %v2252_v9 }
 0x364   : > { %v2259_v58 = vsel %vm2098_vm13, %v2215_v23, 0.0 }
 0x365   : > { %v2155_v51 = vadd.f32 %v2154_v11, %v2153_v4  ;;  %v2256_v36 = vadd.f32 %v2255_v48, %v2254_v54  ;;  %v2226_v11 = vmul.f32 %v4231_v18, %v4231_v18 }
 0x367   : > { %v2258_v62 = vadd.f32 %v2257_v34, %v2256_v36  ;;  %v2157_v60 = vadd.f32 %v2156_v10, %v2155_v51 }
 0x369   : > { %v2260_v41 = vadd.f32 %v2259_v58, %v2258_v62  ;;  %v2178_v62 = vsel %vm2098_vm13, %v4231_v18, 0.0 }
 0x377   : > { %v2068_v47 = vpop.f32.mrf.mxu2 }
 0x378   : > { %2119 = vst.msk [vmem:[%s4120_s29 + $0xa0] sm:$0xff] %vm2098_vm13, %v2068_v47  ;;  %v2222_v17 = vmul.f32 %v2068_v47, %v2068_v47  ;;  %v2170_v28 = vsel %vm2098_vm13, %v2068_v47, 0.0 }
 0x37a   : > { %v2273_v8 = vsel %vm2098_vm13, %v2222_v17, 0.0 }
 0x37f   : > { %v2070_v56 = vpop.f32.mrf.mxu2  ;;  %v4283_v37 = vpop.f32.mrf.mxu3 }
 0x380   : > { %2120 = vst.msk [vmem:[%s4120_s29 + $0xa8] sm:$0xff] %vm2098_vm13, %v2070_v56  ;;  %v2223_v9 = vmul.f32 %v2070_v56, %v2070_v56  ;;  %v2172_v26 = vsel %vm2098_vm13, %v2070_v56, 0.0  ;;  %v2281_v56 = vsel %vm2098_vm13, %v2226_v11, 0.0 }
 0x381   : > { %2125 = vst.msk [vmem:[%s4120_s29 + $0xd0] sm:$0xff] %vm2098_vm13, %v4283_v37 }
 0x382   : > { %v2275_v16 = vsel %vm2098_vm13, %v2223_v9, 0.0 }
 0x387   : > { %v4290_v55 = vpop.f32.mrf.mxu3 }
 0x388   : > { %2126 = vst.msk [vmem:[%s4120_s29 + $0xd8] sm:$0xff] %vm2098_vm13, %v4290_v55 }
 0x389   : > { %v2053_v45 = vpop.f32.mrf.mxu1 }
 0x38a   : > { %2113 = vst.msk [vmem:[%s4120_s29 + $0x70] sm:$0xff] %vm2098_vm13, %v2053_v45  ;;  %v2216_v50 = vmul.f32 %v2053_v45, %v2053_v45  ;;  %v2158_v1 = vsel %vm2098_vm13, %v2053_v45, 0.0  ;;  %v2180_v45 = vsel %vm2098_vm13, %v4240_v12, 0.0 }
 0x38b   : > { %v2159_v29 = vadd.f32 %v2158_v1, %v2157_v60  ;;  %v2227_v60 = vmul.f32 %v4240_v12, %v4240_v12  ;;  %v2229_v12 = vmul.f32 %v4290_v55, %v4290_v55 }
 0x38c   : > { %v2261_v57 = vsel %vm2098_vm13, %v2216_v50, 0.0  ;;  %v2228_v50 = vmul.f32 %v4283_v37, %v4283_v37 }
 0x38d   : > { %v2262_v63 = vadd.f32 %v2261_v57, %v2260_v41  ;;  %v2283_v57 = vsel %vm2098_vm13, %v2227_v60, 0.0  ;;  %v2287_v35 = vsel %vm2098_vm13, %v2229_v12, 0.0 }
 0x391   : > { %v2055_v7 = vpop.f32.mrf.mxu1 }
 0x392   : > { %2114 = vst.msk [vmem:[%s4120_s29 + $0x78] sm:$0xff] %vm2098_vm13, %v2055_v7  ;;  %v2160_v30 = vsel %vm2098_vm13, %v2055_v7, 0.0  ;;  %v2217_v27 = vmul.f32 %v2055_v7, %v2055_v7 }
 0x393   : > { %v2161_v25 = vadd.f32 %v2160_v30, %v2159_v29  ;;  %v2182_v29 = vsel %vm2098_vm13, %v4283_v37, 0.0  ;;  %v2285_v30 = vsel %vm2098_vm13, %v2228_v50, 0.0 }
 0x394   : > { %v2263_v38 = vsel %vm2098_vm13, %v2217_v27, 0.0 }
 0x395   : > { %v2163_v43 = vadd.f32 %v2162_v44, %v2161_v25  ;;  %v2264_v40 = vadd.f32 %v2263_v38, %v2262_v63  ;;  %v2184_v25 = vsel %vm2098_vm13, %v4290_v55, 0.0 }
 0x397   : > { %v2165_v59 = vadd.f32 %v2164_v22, %v2163_v43  ;;  %v2266_v6 = vadd.f32 %v2265_v31, %v2264_v40 }
 0x399   : > { %v2167_v32 = vadd.f32 %v2166_v14, %v2165_v59  ;;  %v2268_v21 = vadd.f32 %v2267_v61, %v2266_v6 }
 0x39b   : > { %v2270_v33 = vadd.f32 %v2269_v5, %v2268_v21  ;;  %v2169_v53 = vadd.f32 %v2168_v52, %v2167_v32 }
 0x39d   : > { %v2171_v13 = vadd.f32 %v2170_v28, %v2169_v53  ;;  %v2272_v42 = vadd.f32 %v2271_v20, %v2270_v33 }
 0x39f   : > { %v2274_v46 = vadd.f32 %v2273_v8, %v2272_v42  ;;  %v2173_v3 = vadd.f32 %v2172_v26, %v2171_v13 }
 0x3a1   : > { %v2276_v54 = vadd.f32 %v2275_v16, %v2274_v46 }
 0x3a6   : > { %v2073_v39 = vpop.f32.mrf.mxu2 }
 0x3a7   : > { %2121 = vst.msk [vmem:[%s4120_s29 + $0xb0] sm:$0xff] %vm2098_vm13, %v2073_v39  ;;  %v2224_v19 = vmul.f32 %v2073_v39, %v2073_v39  ;;  %v2174_v15 = vsel %vm2098_vm13, %v2073_v39, 0.0 }
 0x3a8   : > { %v2175_v4 = vadd.f32 %v2174_v15, %v2173_v3 }
 0x3a9   : > { %v2277_v2 = vsel %vm2098_vm13, %v2224_v19, 0.0 }
 0x3aa   : > { %v2278_v36 = vadd.f32 %v2277_v2, %v2276_v54 }
 0x3ae   : > { %v2075_v48 = vpop.f32.mrf.mxu2 }
 0x3af   : > { %2122 = vst.msk [vmem:[%s4120_s29 + $0xb8] sm:$0xff] %vm2098_vm13, %v2075_v48  ;;  %v2176_v23 = vsel %vm2098_vm13, %v2075_v48, 0.0  ;;  %v2225_v51 = vmul.f32 %v2075_v48, %v2075_v48  ;;  %v2088_v10 = vpop.f32.mrf.mxu3 }
 0x3b0   : > { %v2177_v34 = vadd.f32 %v2176_v23, %v2175_v4  ;;  %2127 = vst.msk [vmem:[%s4120_s29 + $0xe0] sm:$0xff] %vm2098_vm13, %v2088_v10  ;;  %v2230_v38 = vmul.f32 %v2088_v10, %v2088_v10  ;;  %v2186_v40 = vsel %vm2098_vm13, %v2088_v10, 0.0 }
 0x3b1   : > { %v2279_v58 = vsel %vm2098_vm13, %v2225_v51, 0.0 }
 0x3b2   : > { %v2179_v41 = vadd.f32 %v2178_v62, %v2177_v34  ;;  %v2280_v47 = vadd.f32 %v2279_v58, %v2278_v36  ;;  %v2289_v22 = vsel %vm2098_vm13, %v2230_v38, 0.0 }
 0x3b4   : > { %v2181_v1 = vadd.f32 %v2180_v45, %v2179_v41  ;;  %v2282_v18 = vadd.f32 %v2281_v56, %v2280_v47 }
 0x3b6   : > { %v2284_v7 = vadd.f32 %v2283_v57, %v2282_v18  ;;  %v2183_v0 = vadd.f32 %v2182_v29, %v2181_v1 }
 0x3b7   : > { %v2090_v63 = vpop.f32.mrf.mxu3 }
 0x3b8   : > { %v2286_v27 = vadd.f32 %v2285_v30, %v2284_v7  ;;  %2128 = vst.msk [vmem:[%s4120_s29 + $0xe8] sm:$0xff] %vm2098_vm13, %v2090_v63  ;;  %v2185_v44 = vadd.f32 %v2184_v25, %v2183_v0  ;;  %v2231_v49 = vmul.f32 %v2090_v63, %v2090_v63  ;;  %v2188_v61 = vsel %vm2098_vm13, %v2090_v63, 0.0 }
 0x3ba   : > { %v2288_v43 = vadd.f32 %v2287_v35, %v2286_v27  ;;  %v2187_v31 = vadd.f32 %v2186_v40, %v2185_v44  ;;  %v2291_v24 = vsel %vm2098_vm13, %v2231_v49, 0.0 }
 0x3bc   : > { %v2290_v6 = vadd.f32 %v2289_v22, %v2288_v43  ;;  %v2189_v14 = vadd.f32 %v2188_v61, %v2187_v31 }
 0x3be   : > { %v2292_v21 = vadd.f32 %v2291_v24, %v2290_v6 }
 0x3c7   : > { %v2093_v37 = vpop.f32.mrf.mxu3 }
 0x3c8   : > { %2129 = vst.msk [vmem:[%s4120_s29 + $0xf0] sm:$0xff] %vm2098_vm13, %v2093_v37  ;;  %v2232_v59 = vmul.f32 %v2093_v37, %v2093_v37  ;;  %v2190_v55 = vsel %vm2098_vm13, %v2093_v37, 0.0 }
 0x3c9   : > { %v2191_v5 = vadd.f32 %v2190_v55, %v2189_v14 }
 0x3ca   : > { %v2293_v32 = vsel %vm2098_vm13, %v2232_v59, 0.0 }
 0x3cb   : > { %v2294_v53 = vadd.f32 %v2293_v32, %v2292_v21 }
 0x3cf   : > { %v2095_v52 = vpop.f32.mrf.mxu3 }
 0x3d0   : > { %2130 = vst.msk [vmem:[%s4120_s29 + $0xf8] sm:$0xff] %vm2098_vm13, %v2095_v52  ;;  %v2192_v17 = vsel %vm2098_vm13, %v2095_v52, 0.0  ;;  %v2233_v33 = vmul.f32 %v2095_v52, %v2095_v52 }
 0x3d1   : > { %v2193_v20 = vadd.f32 %v2192_v17, %v2191_v5 }
 0x3d2   : > { %v2295_v28 = vsel %vm2098_vm13, %v2233_v33, 0.0 }
 0x3d3   : > { %v2194_v13 = vrot.slane %v2193_v20, 4  ;;  %v2296_v42 = vadd.f32 %v2295_v28, %v2294_v53 }
 0x3d5   : > { %v2195_v8 = vadd.f32 %v2194_v13, %v2193_v20  ;;  %v2297_v46 = vrot.slane %v2296_v42, 4 }
 0x3d7   : > { %v2196_v39 = vrot.slane %v2195_v8, 2  ;;  %v2298_v9 = vadd.f32 %v2297_v46, %v2296_v42 }
 0x3d9   : > { %v2197_v19 = vadd.f32 %v2196_v39, %v2195_v8  ;;  %v2299_v26 = vrot.slane %v2298_v9, 2 }
 0x3db   : > { %v2198_v15 = vrot.slane %v2197_v19, 1  ;;  %v2300_v3 = vadd.f32 %v2299_v26, %v2298_v9 }
 0x3dd   : > { %v2199_v16 = vadd.f32 %v2198_v15, %v2197_v19  ;;  %v2301_v2 = vrot.slane %v2300_v3, 1 }
 0x3df   : > { %2201 = vst.msk [vmem:[%s171_s8] sm:$0x1] %vm2200_vm14, %v2199_v16  ;;  %v2302_v4 = vadd.f32 %v2301_v2, %v2300_v3 }
 0x3e1   : > { %2303 = vst.msk [vmem:[%s171_s8 + $0x1] sm:$0x1] %vm2200_vm14, %v2302_v4 }
 0x3e2   : > { %2615 = shalt.err (!%p2612_p3)
}
 0x3e3   : > { %2541 = dma.vmem_to_hbm [thread:$0]  (%p2718_p5), %s2326_s9, 32, %s2328_s10, %s2310_s16  }
 0x3e4 PF: > { %p2547_p4 = scmp.ge.s32.totalorder %s2650_s15, 2  ;;  %s2347_s28 = sand.u32 1, %s2638_s12  }
 0x3e5   : > { %s2348_s29 = scalar_lea.sflag [#allocation4], %s2347_s28 }
 0x3e6   : > { %p2544_p7 = pnand %p2547_p4, %p2722_p6 }
 0x3e8   : > { %p2545_p8 = pneg %p2544_p7 }
 0x3ea   : > { %2633 = dma.done.wait (%p2545_p8), %s2348_s29, 32  }
 0x3eb   : > { %2635 = vsyncadd (%p2545_p8), %s2348_s29, 4294967264  ;;  %p14_p9 = scmp.ge.s32.totalorder %s2705_s18, 4   ;;  %s4624_s12 = smov %s2642_s13 }
 0x3ec   : > { %s4625_s13 = smov %s2646_s14  ;;  %s4626_s14 = smov %s2716_s21 }
 0x3ed   : > { %s4627_s15 = smov %s2705_s18  ;;  %16 = sbr.rel (!%p14_p9) target bundleno = 3 (0x3), region = 75 }
 0x3f2   :  { %2354 = vsyncpa [#allocation4], 1 }
 0x3f3   :  { %2356 = vsyncpa [#allocation4 + $0x1], 1 }

</bundles_post_ra>
